<compile_context>
chip_gen: v6e
topology: v6e:2x2x1
jax: 0.10.0
libtpu: 0.0.40
codegen_flags: <defaults>
</compile_context>

<pallas_src>
import functools

import jax
import jax.numpy as jnp
from jax import lax
from jax.experimental import pallas as pl
from jax.experimental.pallas import tpu as pltpu


def _round_up(v, m):
    return ((v + m - 1) // m) * m


# ---------------------------------------------------------------------------
# Single fused kernel:
#   grid over M = batch*time row tiles
#     - stream x tiles, accumulate sum(relu(x @ W1 + b1)) in VMEM scratch
#   on the last grid step:
#     - mean_h = sum / M ; logits row-by-row (W2 pre-split to [n, H, n])
#     - edge_probs = sigmoid(logits)                         -> ep_ref [n, n]
#     - acyclicity = trace(expm(E*E)) - n (unrolled Taylor)  -> acy_ref [1,1]
#     - sparsity   = sum |E|                                  -> spars_ref [1,1]
# ---------------------------------------------------------------------------
def _fused_kernel(x_ref, w1_ref, b1_ref, w2_ref, b2_ref,
                  ep_ref, acy_ref, spars_ref,
                  hsum_ref,
                  *, n, m_total, m_padded, tm, num_terms):
    i = pl.program_id(0)

    @pl.when(i == 0)
    def _init():
        hsum_ref[...] = jnp.zeros_like(hsum_ref)

    # First layer on the current row tile (MXU), accumulate row-sum of h.
    h = jnp.dot(x_ref[...], w1_ref[...], preferred_element_type=jnp.float32)
    h = jnp.maximum(h + b1_ref[...], 0.0)
    if m_padded != m_total:
        # Mask zero-padded rows so they do not contribute to the mean.
        row_ids = lax.broadcasted_iota(jnp.int32, (tm, 1), 0) + i * tm
        h = jnp.where(row_ids < m_total, h, 0.0)
    hsum_ref[...] += jnp.sum(h, axis=0, keepdims=True)

    @pl.when(i == pl.num_programs(0) - 1)
    def _finalize():
        # Linearity: mean over rows commutes with the affine second layer.
        mean_h = hsum_ref[...] * jnp.float32(1.0 / m_total)          # [1, H]

        # Second layer, one output row at a time (w2 pre-split to [n, H, n]
        # in the wrapper so no in-kernel reshape / lane-offset slicing).
        for r in range(n):
            logit_r = jnp.dot(mean_h, w2_ref[r],
                              preferred_element_type=jnp.float32) + b2_ref[r]
            ep_ref[r:r + 1, :] = jax.nn.sigmoid(logit_r)             # [1, n]

        # Regularizers on the freshly written edge-prob matrix (stays in VMEM).
        e = ep_ref[...]                                              # [n, n]
        a = e * e
        eye = jnp.eye(n, dtype=jnp.float32)

        # trace(expm(A)) - n == sum_{k>=1} trace(A^k / k!)  (unrolled Taylor).
        term = eye
        acy = jnp.float32(0.0)
        for k in range(1, num_terms + 1):
            term = jnp.dot(term, a, preferred_element_type=jnp.float32) * (1.0 / k)
            acy = acy + jnp.sum(term * eye)

        acy_ref[...] = acy.reshape(1, 1)
        spars_ref[...] = jnp.sum(jnp.abs(e)).reshape(1, 1)


# ---------------------------------------------------------------------------
# Single jitted wrapper: edge_probs + loss in one launch (target=None path).
# ---------------------------------------------------------------------------
@functools.partial(jax.jit, static_argnames=("num_terms", "row_tile"))
def forward_and_loss(x, w1, b1, w2, b2,
                     acyclicity_weight=1.0, sparsity_weight=0.1,
                     target=None,
                     num_terms=20, row_tile=512):
    B, T, D = x.shape
    n = D
    H = w1.shape[1]
    M = B * T

    x_flat = x.reshape(M, D).astype(jnp.float32)

    # Row tile over M: full array if small, else 512-row tiles (conservative
    # for v7x's 64 MiB VMEM; raise row_tile on v6e if M gets large).
    if M <= row_tile:
        tm = _round_up(M, 8)
    else:
        tm = row_tile
    m_pad = _round_up(M, tm)
    if m_pad != M:
        x_flat = jnp.pad(x_flat, ((0, m_pad - M), (0, 0)))

    # Layout plumbing in the wrapper (outside the kernel, fused by XLA):
    w1f = w1.astype(jnp.float32)
    b1_row = b1.reshape(1, H).astype(jnp.float32)
    w2_split = w2.astype(jnp.float32).reshape(H, n, n).transpose(1, 0, 2)  # [n, H, n]
    b2_split = b2.astype(jnp.float32).reshape(n, 1, n)                     # [n, 1, n]

    grid = (m_pad // tm,)

    kernel = functools.partial(
        _fused_kernel, n=n, m_total=M, m_padded=m_pad, tm=tm, num_terms=num_terms)

    ep, acy, spars = pl.pallas_call(
        kernel,
        out_shape=(
            jax.ShapeDtypeStruct((n, n), jnp.float32),
            jax.ShapeDtypeStruct((1, 1), jnp.float32),
            jax.ShapeDtypeStruct((1, 1), jnp.float32),
        ),
        grid_spec=pltpu.PrefetchScalarGridSpec(
            num_scalar_prefetch=0,
            grid=grid,
            in_specs=[
                pl.BlockSpec((tm, D), lambda i: (i, 0)),        # x tiles (pipelined)
                pl.BlockSpec((D, H), lambda i: (0, 0)),         # w1 (resident)
                pl.BlockSpec((1, H), lambda i: (0, 0)),         # b1
                pl.BlockSpec((n, H, n), lambda i: (0, 0, 0)),   # w2 split per row
                pl.BlockSpec((n, 1, n), lambda i: (0, 0, 0)),   # b2 split per row
            ],
            out_specs=(
                pl.BlockSpec((n, n), lambda i: (0, 0)),         # edge probs
                pl.BlockSpec((1, 1), lambda i: (0, 0)),         # acyclicity
                pl.BlockSpec((1, 1), lambda i: (0, 0)),         # sparsity
            ),
            scratch_shapes=[pltpu.VMEM((1, H), jnp.float32)],   # sum(h) accumulator
        ),
        compiler_params=pltpu.CompilerParams(
            dimension_semantics=("arbitrary",),   # M axis carries the accumulator
        ),
    )(x_flat, w1f, b1_row, w2_split, b2_split)

    acy_s = acy[0, 0]
    spars_s = spars[0, 0]
    components = {
        "acyclicity": acy_s * acyclicity_weight,
        "sparsity": spars_s * sparsity_weight,
    }
    if target is not None:
        # Supervised BCE branch of calculate_loss (pure JAX; trivially small).
        p = jnp.clip(ep, 1e-7, 1.0 - 1e-7)
        supervised = -jnp.mean(target * jnp.log(p) + (1.0 - target) * jnp.log(1.0 - p))
        components["supervised"] = supervised
    else:
        supervised = 0.0
    total = supervised + components["acyclicity"] + components["sparsity"]
    components["total"] = total
    return ep, total, components


# ---------------------------------------------------------------------------
# Deterministic parameter init (xavier_uniform weights, zero biases) + ref.
# ---------------------------------------------------------------------------
def xavier_uniform(key, fan_in, fan_out):
    bound = jnp.sqrt(6.0 / (fan_in + fan_out))
    return jax.random.uniform(
        key, (fan_in, fan_out), minval=-bound, maxval=bound, dtype=jnp.float32)


def pure_jax_reference(x, w1, b1, w2, b2, input_dim, acy_w, sp_w, num_terms=20):
    B, T, D = x.shape
    xf = x.reshape(B * T, D)
    h = jnp.maximum(xf @ w1 + b1, 0.0)
    logits = h @ w2 + b2
    ep = jax.nn.sigmoid(jnp.mean(logits, axis=0)).reshape(input_dim, input_dim)
    a = ep * ep
    eye = jnp.eye(input_dim, dtype=jnp.float32)
    term, acc = eye, eye
    for k in range(1, num_terms + 1):
        term = (term @ a) / k
        acc = acc + term
    acy = jnp.trace(acc) - input_dim
    spars = jnp.sum(jnp.abs(ep))
    return ep, acy * acy_w + spars * sp_w


if __name__ == "__main__":
    input_dim = 4      # number of causal variables n
    hidden_dim = 32
    batch, time_steps = 2, 8
    sparsity_weight = 0.1
    acyclicity_weight = 1.0

    key = jax.random.PRNGKey(0)
    kx, k1, k2 = jax.random.split(key, 3)

    x = jax.random.normal(kx, (batch, time_steps, input_dim), dtype=jnp.float32)
    w1 = xavier_uniform(k1, input_dim, hidden_dim)
    b1 = jnp.zeros((hidden_dim,), jnp.float32)
    w2 = xavier_uniform(k2, hidden_dim, input_dim * input_dim)
    b2 = jnp.zeros((input_dim * input_dim,), jnp.float32)

    edge_probs, total_loss, comps = forward_and_loss(
        x, w1, b1, w2, b2,
        acyclicity_weight=acyclicity_weight, sparsity_weight=sparsity_weight)
    jax.block_until_ready((edge_probs, total_loss))

    ep_ref, total_ref = pure_jax_reference(
        x, w1, b1, w2, b2, input_dim, acyclicity_weight, sparsity_weight)
    assert jnp.allclose(edge_probs, ep_ref, rtol=1e-4, atol=1e-4), (edge_probs, ep_ref)
    assert jnp.allclose(total_loss, total_ref, rtol=1e-3, atol=1e-3), (total_loss, total_ref)

    print("KERNEL_OK")
</pallas_src>

<mosaic_0001>
module attributes {stable_mosaic.version = 11 : i64} {
  func.func @_fused_kernel(%arg0: i32, %arg1: memref<16x4xf32, #tpu.memory_space<vmem>>, %arg2: memref<4x32xf32, #tpu.memory_space<vmem>>, %arg3: memref<1x32xf32, #tpu.memory_space<vmem>>, %arg4: memref<4x32x4xf32, #tpu.memory_space<vmem>>, %arg5: memref<4x1x4xf32, #tpu.memory_space<vmem>>, %arg6: memref<4x4xf32, #tpu.memory_space<vmem>>, %arg7: memref<1x1xf32, #tpu.memory_space<vmem>>, %arg8: memref<1x1xf32, #tpu.memory_space<vmem>>, %arg9: memref<1x32xf32, #tpu.memory_space<vmem>>) attributes {dimension_semantics = [#tpu.dimension_semantics<arbitrary>], iteration_bounds = array<i64: 1>, scalar_prefetch = 0 : i64, scratch_operands = 1 : i64, tpu.core_type = #tpu.core_type<tc>, window_params = [{transform_indices = @transform_0, window_bounds = array<i64: 16, 4>}, {pipeline_mode = #tpu.pipeline_mode<synchronous>, transform_indices = @transform_1, window_bounds = array<i64: 4, 32>}, {pipeline_mode = #tpu.pipeline_mode<synchronous>, transform_indices = @transform_2, window_bounds = array<i64: 1, 32>}, {pipeline_mode = #tpu.pipeline_mode<synchronous>, transform_indices = @transform_3, window_bounds = array<i64: 4, 32, 4>}, {pipeline_mode = #tpu.pipeline_mode<synchronous>, transform_indices = @transform_4, window_bounds = array<i64: 4, 1, 4>}, {pipeline_mode = #tpu.pipeline_mode<synchronous>, transform_indices = @transform_5, window_bounds = array<i64: 4, 4>}, {pipeline_mode = #tpu.pipeline_mode<synchronous>, transform_indices = @transform_6, window_bounds = array<i64: 1, 1>}, {pipeline_mode = #tpu.pipeline_mode<synchronous>, transform_indices = @transform_7, window_bounds = array<i64: 1, 1>}]} {
    %c0_i32 = arith.constant 0 : i32
    %0 = arith.cmpi eq, %arg0, %c0_i32 : i32
    %1 = arith.extui %0 : i1 to i32
    %c0_i32_0 = arith.constant 0 : i32
    %2 = arith.cmpi ne, %1, %c0_i32_0 : i32
    scf.if %2 {
      %cst_14 = arith.constant 0.000000e+00 : f32
      %19 = vector.broadcast %cst_14 : f32 to vector<1x32xf32>
      %c0_15 = arith.constant 0 : index
      %c0_16 = arith.constant 0 : index
      %20 = vector.load %arg9[%c0_15, %c0_16] : memref<1x32xf32, #tpu.memory_space<vmem>>, vector<1x32xf32>
      tpu.vector_store %arg9[%c0_15, %c0_16], %19 {strides = array<i32>} : memref<1x32xf32, #tpu.memory_space<vmem>>, vector<1x32xf32>,
    } else {
    }
    %c0 = arith.constant 0 : index
    %c0_1 = arith.constant 0 : index
    %3 = vector.load %arg1[%c0, %c0_1] : memref<16x4xf32, #tpu.memory_space<vmem>>, vector<16x4xf32>
    %c0_2 = arith.constant 0 : index
    %c0_3 = arith.constant 0 : index
    %4 = vector.load %arg2[%c0_2, %c0_3] : memref<4x32xf32, #tpu.memory_space<vmem>>, vector<4x32xf32>
    %cst = arith.constant dense<0.000000e+00> : vector<16x32xf32>
    %5 = tpu.matmul %3, %4, %cst {dimension_numbers = #tpu.dot_dimension_numbers<[1], [0], [0], [1], [0, 0, 1, 1], [], []>} : vector<16x4xf32>, vector<4x32xf32>, vector<16x32xf32> -> vector<16x32xf32>
    %c0_4 = arith.constant 0 : index
    %c0_5 = arith.constant 0 : index
    %6 = vector.load %arg3[%c0_4, %c0_5] : memref<1x32xf32, #tpu.memory_space<vmem>>, vector<1x32xf32>
    %7 = vector.broadcast %6 : vector<1x32xf32> to vector<16x32xf32>
    %8 = arith.addf %5, %7 : vector<16x32xf32>
    %cst_6 = arith.constant 0.000000e+00 : f32
    %9 = vector.broadcast %cst_6 : f32 to vector<16x32xf32>
    %10 = arith.maximumf %8, %9 : vector<16x32xf32>
    %c0_7 = arith.constant 0 : index
    %c0_8 = arith.constant 0 : index
    %11 = vector.load %arg9[%c0_7, %c0_8] : memref<1x32xf32, #tpu.memory_space<vmem>>, vector<1x32xf32>
    %cst_9 = arith.constant dense<0.000000e+00> : vector<32xf32>
    %12 = vector.multi_reduction <add>, %10, %cst_9 [0] : vector<16x32xf32> to vector<32xf32>
    %13 = vector.shape_cast %12 : vector<32xf32> to vector<1x32xf32>
    %14 = arith.addf %11, %13 : vector<1x32xf32>
    %c0_10 = arith.constant 0 : index
    %c0_11 = arith.constant 0 : index
    %15 = vector.load %arg9[%c0_10, %c0_11] : memref<1x32xf32, #tpu.memory_space<vmem>>, vector<1x32xf32>
    tpu.vector_store %arg9[%c0_10, %c0_11], %14 {strides = array<i32>} : memref<1x32xf32, #tpu.memory_space<vmem>>, vector<1x32xf32>,
    %c0_i32_12 = arith.constant 0 : i32
    %16 = arith.cmpi eq, %arg0, %c0_i32_12 : i32
    %17 = arith.extui %16 : i1 to i32
    %c0_i32_13 = arith.constant 0 : i32
    %18 = arith.cmpi ne, %17, %c0_i32_13 : i32
    scf.if %18 {
      %c0_14 = arith.constant 0 : index
      %c0_15 = arith.constant 0 : index
      %19 = vector.load %arg9[%c0_14, %c0_15] : memref<1x32xf32, #tpu.memory_space<vmem>>, vector<1x32xf32>
      %cst_16 = arith.constant 6.250000e-02 : f32
      %20 = vector.broadcast %cst_16 : f32 to vector<1x32xf32>
      %21 = arith.mulf %19, %20 : vector<1x32xf32>
      %c0_17 = arith.constant 0 : index
      %c0_18 = arith.constant 0 : index
      %c0_19 = arith.constant 0 : index
      %22 = vector.load %arg4[%c0_17, %c0_18, %c0_19] : memref<4x32x4xf32, #tpu.memory_space<vmem>>, vector<1x32x4xf32>
      %23 = vector.shape_cast %22 : vector<1x32x4xf32> to vector<32x4xf32>
      %cst_20 = arith.constant dense<0.000000e+00> : vector<1x4xf32>
      %24 = tpu.matmul %21, %23, %cst_20 {dimension_numbers = #tpu.dot_dimension_numbers<[1], [0], [0], [1], [0, 0, 1, 1], [], []>} : vector<1x32xf32>, vector<32x4xf32>, vector<1x4xf32> -> vector<1x4xf32>
      %c0_21 = arith.constant 0 : index
      %c0_22 = arith.constant 0 : index
      %c0_23 = arith.constant 0 : index
      %25 = vector.load %arg5[%c0_21, %c0_22, %c0_23] : memref<4x1x4xf32, #tpu.memory_space<vmem>>, vector<1x1x4xf32>
      %26 = vector.shape_cast %25 : vector<1x1x4xf32> to vector<1x4xf32>
      %27 = arith.addf %24, %26 : vector<1x4xf32>
      %28 = arith.negf %27 : vector<1x4xf32>
      %29 = math.exp %28 : vector<1x4xf32>
      %cst_24 = arith.constant 1.000000e+00 : f32
      %30 = vector.broadcast %cst_24 : f32 to vector<1x4xf32>
      %31 = arith.addf %30, %29 : vector<1x4xf32>
      %32 = arith.divf %30, %31 : vector<1x4xf32>
      %c0_25 = arith.constant 0 : index
      %c0_26 = arith.constant 0 : index
      %33 = vector.load %arg6[%c0_25, %c0_26] : memref<4x4xf32, #tpu.memory_space<vmem>>, vector<1x4xf32>
      tpu.vector_store %arg6[%c0_25, %c0_26], %32 {strides = array<i32>} : memref<4x4xf32, #tpu.memory_space<vmem>>, vector<1x4xf32>,
      %c1 = arith.constant 1 : index
      %c0_27 = arith.constant 0 : index
      %c0_28 = arith.constant 0 : index
      %34 = vector.load %arg4[%c1, %c0_27, %c0_28] : memref<4x32x4xf32, #tpu.memory_space<vmem>>, vector<1x32x4xf32>
      %35 = vector.shape_cast %34 : vector<1x32x4xf32> to vector<32x4xf32>
      %cst_29 = arith.constant dense<0.000000e+00> : vector<1x4xf32>
      %36 = tpu.matmul %21, %35, %cst_29 {dimension_numbers = #tpu.dot_dimension_numbers<[1], [0], [0], [1], [0, 0, 1, 1], [], []>} : vector<1x32xf32>, vector<32x4xf32>, vector<1x4xf32> -> vector<1x4xf32>
      %c1_30 = arith.constant 1 : index
      %c0_31 = arith.constant 0 : index
      %c0_32 = arith.constant 0 : index
      %37 = vector.load %arg5[%c1_30, %c0_31, %c0_32] : memref<4x1x4xf32, #tpu.memory_space<vmem>>, vector<1x1x4xf32>
      %38 = vector.shape_cast %37 : vector<1x1x4xf32> to vector<1x4xf32>
      %39 = arith.addf %36, %38 : vector<1x4xf32>
      %40 = arith.negf %39 : vector<1x4xf32>
      %41 = math.exp %40 : vector<1x4xf32>
      %cst_33 = arith.constant 1.000000e+00 : f32
      %42 = vector.broadcast %cst_33 : f32 to vector<1x4xf32>
      %43 = arith.addf %42, %41 : vector<1x4xf32>
      %44 = arith.divf %42, %43 : vector<1x4xf32>
      %c1_34 = arith.constant 1 : index
      %c0_35 = arith.constant 0 : index
      %45 = vector.load %arg6[%c1_34, %c0_35] : memref<4x4xf32, #tpu.memory_space<vmem>>, vector<1x4xf32>
      tpu.vector_store %arg6[%c1_34, %c0_35], %44 {strides = array<i32>} : memref<4x4xf32, #tpu.memory_space<vmem>>, vector<1x4xf32>,
      %c2 = arith.constant 2 : index
      %c0_36 = arith.constant 0 : index
      %c0_37 = arith.constant 0 : index
      %46 = vector.load %arg4[%c2, %c0_36, %c0_37] : memref<4x32x4xf32, #tpu.memory_space<vmem>>, vector<1x32x4xf32>
      %47 = vector.shape_cast %46 : vector<1x32x4xf32> to vector<32x4xf32>
      %cst_38 = arith.constant dense<0.000000e+00> : vector<1x4xf32>
      %48 = tpu.matmul %21, %47, %cst_38 {dimension_numbers = #tpu.dot_dimension_numbers<[1], [0], [0], [1], [0, 0, 1, 1], [], []>} : vector<1x32xf32>, vector<32x4xf32>, vector<1x4xf32> -> vector<1x4xf32>
      %c2_39 = arith.constant 2 : index
      %c0_40 = arith.constant 0 : index
      %c0_41 = arith.constant 0 : index
      %49 = vector.load %arg5[%c2_39, %c0_40, %c0_41] : memref<4x1x4xf32, #tpu.memory_space<vmem>>, vector<1x1x4xf32>
      %50 = vector.shape_cast %49 : vector<1x1x4xf32> to vector<1x4xf32>
      %51 = arith.addf %48, %50 : vector<1x4xf32>
      %52 = arith.negf %51 : vector<1x4xf32>
      %53 = math.exp %52 : vector<1x4xf32>
      %cst_42 = arith.constant 1.000000e+00 : f32
      %54 = vector.broadcast %cst_42 : f32 to vector<1x4xf32>
      %55 = arith.addf %54, %53 : vector<1x4xf32>
      %56 = arith.divf %54, %55 : vector<1x4xf32>
      %c2_43 = arith.constant 2 : index
      %c0_44 = arith.constant 0 : index
      %57 = vector.load %arg6[%c2_43, %c0_44] : memref<4x4xf32, #tpu.memory_space<vmem>>, vector<1x4xf32>
      tpu.vector_store %arg6[%c2_43, %c0_44], %56 {strides = array<i32>} : memref<4x4xf32, #tpu.memory_space<vmem>>, vector<1x4xf32>,
      %c3 = arith.constant 3 : index
      %c0_45 = arith.constant 0 : index
      %c0_46 = arith.constant 0 : index
      %58 = vector.load %arg4[%c3, %c0_45, %c0_46] : memref<4x32x4xf32, #tpu.memory_space<vmem>>, vector<1x32x4xf32>
      %59 = vector.shape_cast %58 : vector<1x32x4xf32> to vector<32x4xf32>
      %cst_47 = arith.constant dense<0.000000e+00> : vector<1x4xf32>
      %60 = tpu.matmul %21, %59, %cst_47 {dimension_numbers = #tpu.dot_dimension_numbers<[1], [0], [0], [1], [0, 0, 1, 1], [], []>} : vector<1x32xf32>, vector<32x4xf32>, vector<1x4xf32> -> vector<1x4xf32>
      %c3_48 = arith.constant 3 : index
      %c0_49 = arith.constant 0 : index
      %c0_50 = arith.constant 0 : index
      %61 = vector.load %arg5[%c3_48, %c0_49, %c0_50] : memref<4x1x4xf32, #tpu.memory_space<vmem>>, vector<1x1x4xf32>
      %62 = vector.shape_cast %61 : vector<1x1x4xf32> to vector<1x4xf32>
      %63 = arith.addf %60, %62 : vector<1x4xf32>
      %64 = arith.negf %63 : vector<1x4xf32>
      %65 = math.exp %64 : vector<1x4xf32>
      %cst_51 = arith.constant 1.000000e+00 : f32
      %66 = vector.broadcast %cst_51 : f32 to vector<1x4xf32>
      %67 = arith.addf %66, %65 : vector<1x4xf32>
      %68 = arith.divf %66, %67 : vector<1x4xf32>
      %c3_52 = arith.constant 3 : index
      %c0_53 = arith.constant 0 : index
      %69 = vector.load %arg6[%c3_52, %c0_53] : memref<4x4xf32, #tpu.memory_space<vmem>>, vector<1x4xf32>
      tpu.vector_store %arg6[%c3_52, %c0_53], %68 {strides = array<i32>} : memref<4x4xf32, #tpu.memory_space<vmem>>, vector<1x4xf32>,
      %c0_54 = arith.constant 0 : index
      %c0_55 = arith.constant 0 : index
      %70 = vector.load %arg6[%c0_54, %c0_55] : memref<4x4xf32, #tpu.memory_space<vmem>>, vector<4x4xf32>
      %71 = arith.mulf %70, %70 : vector<4x4xf32>
      %72 = tpu.iota {dimensions = array<i32: 0>} : vector<4x4xi32>
      %73 = tpu.iota {dimensions = array<i32: 1>} : vector<4x4xi32>
      %c0_i32_56 = arith.constant 0 : i32
      %74 = vector.broadcast %c0_i32_56 : i32 to vector<4x4xi32>
      %75 = arith.addi %72, %74 : vector<4x4xi32>
      %76 = arith.cmpi eq, %75, %73 : vector<4x4xi32>
      %77 = arith.extui %76 : vector<4x4xi1> to vector<4x4xi32>
      %78 = arith.sitofp %77 : vector<4x4xi32> to vector<4x4xf32>
      %cst_57 = arith.constant dense<0.000000e+00> : vector<4x4xf32>
      %79 = tpu.matmul %78, %71, %cst_57 {dimension_numbers = #tpu.dot_dimension_numbers<[1], [0], [0], [1], [0, 0, 1, 1], [], []>} : vector<4x4xf32>, vector<4x4xf32>, vector<4x4xf32> -> vector<4x4xf32>
      %cst_58 = arith.constant 1.000000e+00 : f32
      %80 = vector.broadcast %cst_58 : f32 to vector<4x4xf32>
      %81 = arith.mulf %79, %80 : vector<4x4xf32>
      %82 = arith.mulf %81, %78 : vector<4x4xf32>
      %83 = vector.shape_cast %82 : vector<4x4xf32> to vector<1x4x4xf32>
      %cst_59 = arith.constant dense<0.000000e+00> : vector<1xf32>
      %84 = vector.multi_reduction <add>, %83, %cst_59 [1, 2] : vector<1x4x4xf32> to vector<1xf32>
      %85 = vector.shape_cast %84 : vector<1xf32> to vector<1x1x1xf32>
      %86 = vector.extract %85[0, 0, 0] : f32 from vector<1x1x1xf32>
      %cst_60 = arith.constant 0.000000e+00 : f32
      %87 = arith.addf %cst_60, %86 : f32
      %cst_61 = arith.constant dense<0.000000e+00> : vector<4x4xf32>
      %88 = tpu.matmul %81, %71, %cst_61 {dimension_numbers = #tpu.dot_dimension_numbers<[1], [0], [0], [1], [0, 0, 1, 1], [], []>} : vector<4x4xf32>, vector<4x4xf32>, vector<4x4xf32> -> vector<4x4xf32>
      %cst_62 = arith.constant 5.000000e-01 : f32
      %89 = vector.broadcast %cst_62 : f32 to vector<4x4xf32>
      %90 = arith.mulf %88, %89 : vector<4x4xf32>
      %91 = arith.mulf %90, %78 : vector<4x4xf32>
      %92 = vector.shape_cast %91 : vector<4x4xf32> to vector<1x4x4xf32>
      %cst_63 = arith.constant dense<0.000000e+00> : vector<1xf32>
      %93 = vector.multi_reduction <add>, %92, %cst_63 [1, 2] : vector<1x4x4xf32> to vector<1xf32>
      %94 = vector.shape_cast %93 : vector<1xf32> to vector<1x1x1xf32>
      %95 = vector.extract %94[0, 0, 0] : f32 from vector<1x1x1xf32>
      %96 = arith.addf %87, %95 : f32
      %cst_64 = arith.constant dense<0.000000e+00> : vector<4x4xf32>
      %97 = tpu.matmul %90, %71, %cst_64 {dimension_numbers = #tpu.dot_dimension_numbers<[1], [0], [0], [1], [0, 0, 1, 1], [], []>} : vector<4x4xf32>, vector<4x4xf32>, vector<4x4xf32> -> vector<4x4xf32>
      %cst_65 = arith.constant 0.333333343 : f32
      %98 = vector.broadcast %cst_65 : f32 to vector<4x4xf32>
      %99 = arith.mulf %97, %98 : vector<4x4xf32>
      %100 = arith.mulf %99, %78 : vector<4x4xf32>
      %101 = vector.shape_cast %100 : vector<4x4xf32> to vector<1x4x4xf32>
      %cst_66 = arith.constant dense<0.000000e+00> : vector<1xf32>
      %102 = vector.multi_reduction <add>, %101, %cst_66 [1, 2] : vector<1x4x4xf32> to vector<1xf32>
      %103 = vector.shape_cast %102 : vector<1xf32> to vector<1x1x1xf32>
      %104 = vector.extract %103[0, 0, 0] : f32 from vector<1x1x1xf32>
      %105 = arith.addf %96, %104 : f32
      %cst_67 = arith.constant dense<0.000000e+00> : vector<4x4xf32>
      %106 = tpu.matmul %99, %71, %cst_67 {dimension_numbers = #tpu.dot_dimension_numbers<[1], [0], [0], [1], [0, 0, 1, 1], [], []>} : vector<4x4xf32>, vector<4x4xf32>, vector<4x4xf32> -> vector<4x4xf32>
      %cst_68 = arith.constant 2.500000e-01 : f32
      %107 = vector.broadcast %cst_68 : f32 to vector<4x4xf32>
      %108 = arith.mulf %106, %107 : vector<4x4xf32>
      %109 = arith.mulf %108, %78 : vector<4x4xf32>
      %110 = vector.shape_cast %109 : vector<4x4xf32> to vector<1x4x4xf32>
      %cst_69 = arith.constant dense<0.000000e+00> : vector<1xf32>
      %111 = vector.multi_reduction <add>, %110, %cst_69 [1, 2] : vector<1x4x4xf32> to vector<1xf32>
      %112 = vector.shape_cast %111 : vector<1xf32> to vector<1x1x1xf32>
      %113 = vector.extract %112[0, 0, 0] : f32 from vector<1x1x1xf32>
      %114 = arith.addf %105, %113 : f32
      %cst_70 = arith.constant dense<0.000000e+00> : vector<4x4xf32>
      %115 = tpu.matmul %108, %71, %cst_70 {dimension_numbers = #tpu.dot_dimension_numbers<[1], [0], [0], [1], [0, 0, 1, 1], [], []>} : vector<4x4xf32>, vector<4x4xf32>, vector<4x4xf32> -> vector<4x4xf32>
      %cst_71 = arith.constant 2.000000e-01 : f32
      %116 = vector.broadcast %cst_71 : f32 to vector<4x4xf32>
      %117 = arith.mulf %115, %116 : vector<4x4xf32>
      %118 = arith.mulf %117, %78 : vector<4x4xf32>
      %119 = vector.shape_cast %118 : vector<4x4xf32> to vector<1x4x4xf32>
      %cst_72 = arith.constant dense<0.000000e+00> : vector<1xf32>
      %120 = vector.multi_reduction <add>, %119, %cst_72 [1, 2] : vector<1x4x4xf32> to vector<1xf32>
      %121 = vector.shape_cast %120 : vector<1xf32> to vector<1x1x1xf32>
      %122 = vector.extract %121[0, 0, 0] : f32 from vector<1x1x1xf32>
      %123 = arith.addf %114, %122 : f32
      %cst_73 = arith.constant dense<0.000000e+00> : vector<4x4xf32>
      %124 = tpu.matmul %117, %71, %cst_73 {dimension_numbers = #tpu.dot_dimension_numbers<[1], [0], [0], [1], [0, 0, 1, 1], [], []>} : vector<4x4xf32>, vector<4x4xf32>, vector<4x4xf32> -> vector<4x4xf32>
      %cst_74 = arith.constant 0.166666672 : f32
      %125 = vector.broadcast %cst_74 : f32 to vector<4x4xf32>
      %126 = arith.mulf %124, %125 : vector<4x4xf32>
      %127 = arith.mulf %126, %78 : vector<4x4xf32>
      %128 = vector.shape_cast %127 : vector<4x4xf32> to vector<1x4x4xf32>
      %cst_75 = arith.constant dense<0.000000e+00> : vector<1xf32>
      %129 = vector.multi_reduction <add>, %128, %cst_75 [1, 2] : vector<1x4x4xf32> to vector<1xf32>
      %130 = vector.shape_cast %129 : vector<1xf32> to vector<1x1x1xf32>
      %131 = vector.extract %130[0, 0, 0] : f32 from vector<1x1x1xf32>
      %132 = arith.addf %123, %131 : f32
      %cst_76 = arith.constant dense<0.000000e+00> : vector<4x4xf32>
      %133 = tpu.matmul %126, %71, %cst_76 {dimension_numbers = #tpu.dot_dimension_numbers<[1], [0], [0], [1], [0, 0, 1, 1], [], []>} : vector<4x4xf32>, vector<4x4xf32>, vector<4x4xf32> -> vector<4x4xf32>
      %cst_77 = arith.constant 0.142857149 : f32
      %134 = vector.broadcast %cst_77 : f32 to vector<4x4xf32>
      %135 = arith.mulf %133, %134 : vector<4x4xf32>
      %136 = arith.mulf %135, %78 : vector<4x4xf32>
      %137 = vector.shape_cast %136 : vector<4x4xf32> to vector<1x4x4xf32>
      %cst_78 = arith.constant dense<0.000000e+00> : vector<1xf32>
      %138 = vector.multi_reduction <add>, %137, %cst_78 [1, 2] : vector<1x4x4xf32> to vector<1xf32>
      %139 = vector.shape_cast %138 : vector<1xf32> to vector<1x1x1xf32>
      %140 = vector.extract %139[0, 0, 0] : f32 from vector<1x1x1xf32>
      %141 = arith.addf %132, %140 : f32
      %cst_79 = arith.constant dense<0.000000e+00> : vector<4x4xf32>
      %142 = tpu.matmul %135, %71, %cst_79 {dimension_numbers = #tpu.dot_dimension_numbers<[1], [0], [0], [1], [0, 0, 1, 1], [], []>} : vector<4x4xf32>, vector<4x4xf32>, vector<4x4xf32> -> vector<4x4xf32>
      %cst_80 = arith.constant 1.250000e-01 : f32
      %143 = vector.broadcast %cst_80 : f32 to vector<4x4xf32>
      %144 = arith.mulf %142, %143 : vector<4x4xf32>
      %145 = arith.mulf %144, %78 : vector<4x4xf32>
      %146 = vector.shape_cast %145 : vector<4x4xf32> to vector<1x4x4xf32>
      %cst_81 = arith.constant dense<0.000000e+00> : vector<1xf32>
      %147 = vector.multi_reduction <add>, %146, %cst_81 [1, 2] : vector<1x4x4xf32> to vector<1xf32>
      %148 = vector.shape_cast %147 : vector<1xf32> to vector<1x1x1xf32>
      %149 = vector.extract %148[0, 0, 0] : f32 from vector<1x1x1xf32>
      %150 = arith.addf %141, %149 : f32
      %cst_82 = arith.constant dense<0.000000e+00> : vector<4x4xf32>
      %151 = tpu.matmul %144, %71, %cst_82 {dimension_numbers = #tpu.dot_dimension_numbers<[1], [0], [0], [1], [0, 0, 1, 1], [], []>} : vector<4x4xf32>, vector<4x4xf32>, vector<4x4xf32> -> vector<4x4xf32>
      %cst_83 = arith.constant 0.111111112 : f32
      %152 = vector.broadcast %cst_83 : f32 to vector<4x4xf32>
      %153 = arith.mulf %151, %152 : vector<4x4xf32>
      %154 = arith.mulf %153, %78 : vector<4x4xf32>
      %155 = vector.shape_cast %154 : vector<4x4xf32> to vector<1x4x4xf32>
      %cst_84 = arith.constant dense<0.000000e+00> : vector<1xf32>
      %156 = vector.multi_reduction <add>, %155, %cst_84 [1, 2] : vector<1x4x4xf32> to vector<1xf32>
      %157 = vector.shape_cast %156 : vector<1xf32> to vector<1x1x1xf32>
      %158 = vector.extract %157[0, 0, 0] : f32 from vector<1x1x1xf32>
      %159 = arith.addf %150, %158 : f32
      %cst_85 = arith.constant dense<0.000000e+00> : vector<4x4xf32>
      %160 = tpu.matmul %153, %71, %cst_85 {dimension_numbers = #tpu.dot_dimension_numbers<[1], [0], [0], [1], [0, 0, 1, 1], [], []>} : vector<4x4xf32>, vector<4x4xf32>, vector<4x4xf32> -> vector<4x4xf32>
      %cst_86 = arith.constant 1.000000e-01 : f32
      %161 = vector.broadcast %cst_86 : f32 to vector<4x4xf32>
      %162 = arith.mulf %160, %161 : vector<4x4xf32>
      %163 = arith.mulf %162, %78 : vector<4x4xf32>
      %164 = vector.shape_cast %163 : vector<4x4xf32> to vector<1x4x4xf32>
      %cst_87 = arith.constant dense<0.000000e+00> : vector<1xf32>
      %165 = vector.multi_reduction <add>, %164, %cst_87 [1, 2] : vector<1x4x4xf32> to vector<1xf32>
      %166 = vector.shape_cast %165 : vector<1xf32> to vector<1x1x1xf32>
      %167 = vector.extract %166[0, 0, 0] : f32 from vector<1x1x1xf32>
      %168 = arith.addf %159, %167 : f32
      %cst_88 = arith.constant dense<0.000000e+00> : vector<4x4xf32>
      %169 = tpu.matmul %162, %71, %cst_88 {dimension_numbers = #tpu.dot_dimension_numbers<[1], [0], [0], [1], [0, 0, 1, 1], [], []>} : vector<4x4xf32>, vector<4x4xf32>, vector<4x4xf32> -> vector<4x4xf32>
      %cst_89 = arith.constant 0.0909090936 : f32
      %170 = vector.broadcast %cst_89 : f32 to vector<4x4xf32>
      %171 = arith.mulf %169, %170 : vector<4x4xf32>
      %172 = arith.mulf %171, %78 : vector<4x4xf32>
      %173 = vector.shape_cast %172 : vector<4x4xf32> to vector<1x4x4xf32>
      %cst_90 = arith.constant dense<0.000000e+00> : vector<1xf32>
      %174 = vector.multi_reduction <add>, %173, %cst_90 [1, 2] : vector<1x4x4xf32> to vector<1xf32>
      %175 = vector.shape_cast %174 : vector<1xf32> to vector<1x1x1xf32>
      %176 = vector.extract %175[0, 0, 0] : f32 from vector<1x1x1xf32>
      %177 = arith.addf %168, %176 : f32
      %cst_91 = arith.constant dense<0.000000e+00> : vector<4x4xf32>
      %178 = tpu.matmul %171, %71, %cst_91 {dimension_numbers = #tpu.dot_dimension_numbers<[1], [0], [0], [1], [0, 0, 1, 1], [], []>} : vector<4x4xf32>, vector<4x4xf32>, vector<4x4xf32> -> vector<4x4xf32>
      %cst_92 = arith.constant 0.0833333358 : f32
      %179 = vector.broadcast %cst_92 : f32 to vector<4x4xf32>
      %180 = arith.mulf %178, %179 : vector<4x4xf32>
      %181 = arith.mulf %180, %78 : vector<4x4xf32>
      %182 = vector.shape_cast %181 : vector<4x4xf32> to vector<1x4x4xf32>
      %cst_93 = arith.constant dense<0.000000e+00> : vector<1xf32>
      %183 = vector.multi_reduction <add>, %182, %cst_93 [1, 2] : vector<1x4x4xf32> to vector<1xf32>
      %184 = vector.shape_cast %183 : vector<1xf32> to vector<1x1x1xf32>
      %185 = vector.extract %184[0, 0, 0] : f32 from vector<1x1x1xf32>
      %186 = arith.addf %177, %185 : f32
      %cst_94 = arith.constant dense<0.000000e+00> : vector<4x4xf32>
      %187 = tpu.matmul %180, %71, %cst_94 {dimension_numbers = #tpu.dot_dimension_numbers<[1], [0], [0], [1], [0, 0, 1, 1], [], []>} : vector<4x4xf32>, vector<4x4xf32>, vector<4x4xf32> -> vector<4x4xf32>
      %cst_95 = arith.constant 0.0769230798 : f32
      %188 = vector.broadcast %cst_95 : f32 to vector<4x4xf32>
      %189 = arith.mulf %187, %188 : vector<4x4xf32>
      %190 = arith.mulf %189, %78 : vector<4x4xf32>
      %191 = vector.shape_cast %190 : vector<4x4xf32> to vector<1x4x4xf32>
      %cst_96 = arith.constant dense<0.000000e+00> : vector<1xf32>
      %192 = vector.multi_reduction <add>, %191, %cst_96 [1, 2] : vector<1x4x4xf32> to vector<1xf32>
      %193 = vector.shape_cast %192 : vector<1xf32> to vector<1x1x1xf32>
      %194 = vector.extract %193[0, 0, 0] : f32 from vector<1x1x1xf32>
      %195 = arith.addf %186, %194 : f32
      %cst_97 = arith.constant dense<0.000000e+00> : vector<4x4xf32>
      %196 = tpu.matmul %189, %71, %cst_97 {dimension_numbers = #tpu.dot_dimension_numbers<[1], [0], [0], [1], [0, 0, 1, 1], [], []>} : vector<4x4xf32>, vector<4x4xf32>, vector<4x4xf32> -> vector<4x4xf32>
      %cst_98 = arith.constant 0.0714285746 : f32
      %197 = vector.broadcast %cst_98 : f32 to vector<4x4xf32>
      %198 = arith.mulf %196, %197 : vector<4x4xf32>
      %199 = arith.mulf %198, %78 : vector<4x4xf32>
      %200 = vector.shape_cast %199 : vector<4x4xf32> to vector<1x4x4xf32>
      %cst_99 = arith.constant dense<0.000000e+00> : vector<1xf32>
      %201 = vector.multi_reduction <add>, %200, %cst_99 [1, 2] : vector<1x4x4xf32> to vector<1xf32>
      %202 = vector.shape_cast %201 : vector<1xf32> to vector<1x1x1xf32>
      %203 = vector.extract %202[0, 0, 0] : f32 from vector<1x1x1xf32>
      %204 = arith.addf %195, %203 : f32
      %cst_100 = arith.constant dense<0.000000e+00> : vector<4x4xf32>
      %205 = tpu.matmul %198, %71, %cst_100 {dimension_numbers = #tpu.dot_dimension_numbers<[1], [0], [0], [1], [0, 0, 1, 1], [], []>} : vector<4x4xf32>, vector<4x4xf32>, vector<4x4xf32> -> vector<4x4xf32>
      %cst_101 = arith.constant 0.0666666701 : f32
      %206 = vector.broadcast %cst_101 : f32 to vector<4x4xf32>
      %207 = arith.mulf %205, %206 : vector<4x4xf32>
      %208 = arith.mulf %207, %78 : vector<4x4xf32>
      %209 = vector.shape_cast %208 : vector<4x4xf32> to vector<1x4x4xf32>
      %cst_102 = arith.constant dense<0.000000e+00> : vector<1xf32>
      %210 = vector.multi_reduction <add>, %209, %cst_102 [1, 2] : vector<1x4x4xf32> to vector<1xf32>
      %211 = vector.shape_cast %210 : vector<1xf32> to vector<1x1x1xf32>
      %212 = vector.extract %211[0, 0, 0] : f32 from vector<1x1x1xf32>
      %213 = arith.addf %204, %212 : f32
      %cst_103 = arith.constant dense<0.000000e+00> : vector<4x4xf32>
      %214 = tpu.matmul %207, %71, %cst_103 {dimension_numbers = #tpu.dot_dimension_numbers<[1], [0], [0], [1], [0, 0, 1, 1], [], []>} : vector<4x4xf32>, vector<4x4xf32>, vector<4x4xf32> -> vector<4x4xf32>
      %cst_104 = arith.constant 6.250000e-02 : f32
      %215 = vector.broadcast %cst_104 : f32 to vector<4x4xf32>
      %216 = arith.mulf %214, %215 : vector<4x4xf32>
      %217 = arith.mulf %216, %78 : vector<4x4xf32>
      %218 = vector.shape_cast %217 : vector<4x4xf32> to vector<1x4x4xf32>
      %cst_105 = arith.constant dense<0.000000e+00> : vector<1xf32>
      %219 = vector.multi_reduction <add>, %218, %cst_105 [1, 2] : vector<1x4x4xf32> to vector<1xf32>
      %220 = vector.shape_cast %219 : vector<1xf32> to vector<1x1x1xf32>
      %221 = vector.extract %220[0, 0, 0] : f32 from vector<1x1x1xf32>
      %222 = arith.addf %213, %221 : f32
      %cst_106 = arith.constant dense<0.000000e+00> : vector<4x4xf32>
      %223 = tpu.matmul %216, %71, %cst_106 {dimension_numbers = #tpu.dot_dimension_numbers<[1], [0], [0], [1], [0, 0, 1, 1], [], []>} : vector<4x4xf32>, vector<4x4xf32>, vector<4x4xf32> -> vector<4x4xf32>
      %cst_107 = arith.constant 0.0588235296 : f32
      %224 = vector.broadcast %cst_107 : f32 to vector<4x4xf32>
      %225 = arith.mulf %223, %224 : vector<4x4xf32>
      %226 = arith.mulf %225, %78 : vector<4x4xf32>
      %227 = vector.shape_cast %226 : vector<4x4xf32> to vector<1x4x4xf32>
      %cst_108 = arith.constant dense<0.000000e+00> : vector<1xf32>
      %228 = vector.multi_reduction <add>, %227, %cst_108 [1, 2] : vector<1x4x4xf32> to vector<1xf32>
      %229 = vector.shape_cast %228 : vector<1xf32> to vector<1x1x1xf32>
      %230 = vector.extract %229[0, 0, 0] : f32 from vector<1x1x1xf32>
      %231 = arith.addf %222, %230 : f32
      %cst_109 = arith.constant dense<0.000000e+00> : vector<4x4xf32>
      %232 = tpu.matmul %225, %71, %cst_109 {dimension_numbers = #tpu.dot_dimension_numbers<[1], [0], [0], [1], [0, 0, 1, 1], [], []>} : vector<4x4xf32>, vector<4x4xf32>, vector<4x4xf32> -> vector<4x4xf32>
      %cst_110 = arith.constant 0.055555556 : f32
      %233 = vector.broadcast %cst_110 : f32 to vector<4x4xf32>
      %234 = arith.mulf %232, %233 : vector<4x4xf32>
      %235 = arith.mulf %234, %78 : vector<4x4xf32>
      %236 = vector.shape_cast %235 : vector<4x4xf32> to vector<1x4x4xf32>
      %cst_111 = arith.constant dense<0.000000e+00> : vector<1xf32>
      %237 = vector.multi_reduction <add>, %236, %cst_111 [1, 2] : vector<1x4x4xf32> to vector<1xf32>
      %238 = vector.shape_cast %237 : vector<1xf32> to vector<1x1x1xf32>
      %239 = vector.extract %238[0, 0, 0] : f32 from vector<1x1x1xf32>
      %240 = arith.addf %231, %239 : f32
      %cst_112 = arith.constant dense<0.000000e+00> : vector<4x4xf32>
      %241 = tpu.matmul %234, %71, %cst_112 {dimension_numbers = #tpu.dot_dimension_numbers<[1], [0], [0], [1], [0, 0, 1, 1], [], []>} : vector<4x4xf32>, vector<4x4xf32>, vector<4x4xf32> -> vector<4x4xf32>
      %cst_113 = arith.constant 0.0526315793 : f32
      %242 = vector.broadcast %cst_113 : f32 to vector<4x4xf32>
      %243 = arith.mulf %241, %242 : vector<4x4xf32>
      %244 = arith.mulf %243, %78 : vector<4x4xf32>
      %245 = vector.shape_cast %244 : vector<4x4xf32> to vector<1x4x4xf32>
      %cst_114 = arith.constant dense<0.000000e+00> : vector<1xf32>
      %246 = vector.multi_reduction <add>, %245, %cst_114 [1, 2] : vector<1x4x4xf32> to vector<1xf32>
      %247 = vector.shape_cast %246 : vector<1xf32> to vector<1x1x1xf32>
      %248 = vector.extract %247[0, 0, 0] : f32 from vector<1x1x1xf32>
      %249 = arith.addf %240, %248 : f32
      %cst_115 = arith.constant dense<0.000000e+00> : vector<4x4xf32>
      %250 = tpu.matmul %243, %71, %cst_115 {dimension_numbers = #tpu.dot_dimension_numbers<[1], [0], [0], [1], [0, 0, 1, 1], [], []>} : vector<4x4xf32>, vector<4x4xf32>, vector<4x4xf32> -> vector<4x4xf32>
      %cst_116 = arith.constant 5.000000e-02 : f32
      %251 = vector.broadcast %cst_116 : f32 to vector<4x4xf32>
      %252 = arith.mulf %250, %251 : vector<4x4xf32>
      %253 = arith.mulf %252, %78 : vector<4x4xf32>
      %254 = vector.shape_cast %253 : vector<4x4xf32> to vector<1x4x4xf32>
      %cst_117 = arith.constant dense<0.000000e+00> : vector<1xf32>
      %255 = vector.multi_reduction <add>, %254, %cst_117 [1, 2] : vector<1x4x4xf32> to vector<1xf32>
      %256 = vector.shape_cast %255 : vector<1xf32> to vector<1x1x1xf32>
      %257 = vector.extract %256[0, 0, 0] : f32 from vector<1x1x1xf32>
      %258 = arith.addf %249, %257 : f32
      %259 = vector.broadcast %258 : f32 to vector<1x1xf32>
      %c0_118 = arith.constant 0 : index
      %c0_119 = arith.constant 0 : index
      %260 = vector.load %arg7[%c0_118, %c0_119] : memref<1x1xf32, #tpu.memory_space<vmem>>, vector<1x1xf32>
      tpu.vector_store %arg7[%c0_118, %c0_119], %259 {strides = array<i32>} : memref<1x1xf32, #tpu.memory_space<vmem>>, vector<1x1xf32>,
      %261 = math.absf %70 : vector<4x4xf32>
      %262 = vector.shape_cast %261 : vector<4x4xf32> to vector<1x4x4xf32>
      %cst_120 = arith.constant dense<0.000000e+00> : vector<1xf32>
      %263 = vector.multi_reduction <add>, %262, %cst_120 [1, 2] : vector<1x4x4xf32> to vector<1xf32>
      %264 = vector.shape_cast %263 : vector<1xf32> to vector<1x1x1xf32>
      %265 = vector.extract %264[0, 0, 0] : f32 from vector<1x1x1xf32>
      %266 = vector.broadcast %265 : f32 to vector<1x1xf32>
      %c0_121 = arith.constant 0 : index
      %c0_122 = arith.constant 0 : index
      %267 = vector.load %arg8[%c0_121, %c0_122] : memref<1x1xf32, #tpu.memory_space<vmem>>, vector<1x1xf32>
      tpu.vector_store %arg8[%c0_121, %c0_122], %266 {strides = array<i32>} : memref<1x1xf32, #tpu.memory_space<vmem>>, vector<1x1xf32>,
    } else {
    }
    return
  }
  func.func @transform_0(%arg0: i32) -> (i32, i32) {
    %c0_i32 = arith.constant 0 : i32
    %c0_i32_0 = arith.constant 0 : i32
    return %arg0, %c0_i32 : i32, i32
  }
  func.func @transform_1(%arg0: i32) -> (i32, i32) {
    %c0_i32 = arith.constant 0 : i32
    %c0_i32_0 = arith.constant 0 : i32
    %c0_i32_1 = arith.constant 0 : i32
    return %c0_i32, %c0_i32_0 : i32, i32
  }
  func.func @transform_2(%arg0: i32) -> (i32, i32) {
    %c0_i32 = arith.constant 0 : i32
    %c0_i32_0 = arith.constant 0 : i32
    %c0_i32_1 = arith.constant 0 : i32
    return %c0_i32, %c0_i32_0 : i32, i32
  }
  func.func @transform_3(%arg0: i32) -> (i32, i32, i32) {
    %c0_i32 = arith.constant 0 : i32
    %c0_i32_0 = arith.constant 0 : i32
    %c0_i32_1 = arith.constant 0 : i32
    %c0_i32_2 = arith.constant 0 : i32
    return %c0_i32, %c0_i32_0, %c0_i32_1 : i32, i32, i32
  }
  func.func @transform_4(%arg0: i32) -> (i32, i32, i32) {
    %c0_i32 = arith.constant 0 : i32
    %c0_i32_0 = arith.constant 0 : i32
    %c0_i32_1 = arith.constant 0 : i32
    %c0_i32_2 = arith.constant 0 : i32
    return %c0_i32, %c0_i32_0, %c0_i32_1 : i32, i32, i32
  }
  func.func @transform_5(%arg0: i32) -> (i32, i32) {
    %c0_i32 = arith.constant 0 : i32
    %c0_i32_0 = arith.constant 0 : i32
    %c0_i32_1 = arith.constant 0 : i32
    return %c0_i32, %c0_i32_0 : i32, i32
  }
  func.func @transform_6(%arg0: i32) -> (i32, i32) {
    %c0_i32 = arith.constant 0 : i32
    %c0_i32_0 = arith.constant 0 : i32
    %c0_i32_1 = arith.constant 0 : i32
    return %c0_i32, %c0_i32_0 : i32, i32
  }
  func.func @transform_7(%arg0: i32) -> (i32, i32) {
    %c0_i32 = arith.constant 0 : i32
    %c0_i32_0 = arith.constant 0 : i32
    %c0_i32_1 = arith.constant 0 : i32
    return %c0_i32, %c0_i32_0 : i32, i32
  }
}

</mosaic_0001>

<bundles_post_ra>
// kernel: forward_and_loss.1
= control target key start
LH: loop header
LB: loop body
LE: loop exit
PB: predicated region body
PF: predicated region fallthrough
CT: control target
= control target key end

     0   :  { %13 = vsyncpa [#allocation4], 0  ;;  %vm48_vm0 = vcmask 1043456   ;;  %vm41_vm1 = vcmask 31744   ;;  %s3017_s0 = inlined_call_operand.vmem [shape: f32[16,4], index: 0, kind: input, shape index: {}]   ;;  %s3018_s1 = inlined_call_operand.vmem [shape: f32[4,32], index: 1, kind: input, shape index: {}]   ;;  %s3019_s2 = inlined_call_operand.vmem [shape: f32[1,32], index: 2, kind: input, shape index: {}]   ;;  %s3020_s3 = inlined_call_operand.vmem [shape: f32[4,32,4], index: 3, kind: input, shape index: {}]   ;;  %s3021_s4 = inlined_call_operand.vmem [shape: f32[4,1,4], index: 4, kind: input, shape index: {}]   ;;  %s3022_s5 = inlined_call_operand.hbm [shape: f32[4,4], index: 5, kind: output, shape index: {0}]   ;;  %s3023_s6 = inlined_call_operand.hbm [shape: f32[1,1], index: 6, kind: output, shape index: {1}]   ;;  %s3024_s7 = inlined_call_operand.hbm [shape: f32[1,1], index: 7, kind: output, shape index: {2}]  }
   0x1   :  { %v33_v0 = vld [vmem:[%s3018_s1] sm:$0xf]  ;;  %v32_v2 = vld [vmem:[%s3017_s0 + $0x8] sm:$0xff] }
   0x2   :  { %v31_v1 = vld [vmem:[%s3017_s0] sm:$0xff]  ;;  %2406 = vmatprep.subr.msk.mxu0 %vm48_vm0, %v33_v0 }
   0x3   :  { %2408 = vmatprep.mubr.msk.f32.mxu0 %vm41_vm1, %v31_v1 }
   0x4   :  { %14 = vsyncpa [#allocation6], 0  ;;  %2407 = vmatpush3.msk.msra.mxu0 %vm48_vm0, %v33_v0  ;;  %vm29_vm2 = vcmask 253952   ;;  %v2682_v3 = vmov 0.0   ;;  %v151_v4 = vld [vmem:[%s3020_s3 + $0x18] sm:$0xff]  ;;  %v150_v6 = vld [vmem:[%s3020_s3 + $0x10] sm:$0xff] }
   0x5   :  { %2409 = vmatmul.mubr.msk.f32.vlgmr.msra.gmra.mxu0 %vm41_vm1, %v32_v2  ;;  %30 = vst.msk [vmem:[#allocation2] sm:$0x1] %vm29_vm2, %v2682_v3  ;;  %2411 = vmatprep.subr.mxu1 %v2682_v3  ;;  %v2284_v5 = vld [vmem:[%s3020_s3 + $0x38] sm:$0xff]  ;;  %v2283_v7 = vld [vmem:[%s3020_s3 + $0x30] sm:$0xff]  ;;  %v149_v8 = vld [vmem:[%s3020_s3 + $0x8] sm:$0xff]  ;;  %vm2683_vm3 = vmmov 0  }
   0x6   :  { %2422 = vmatprep.subr.mxu0 %v2682_v3  ;;  %2412 = vmatpush3.msra.mxu1 %v151_v4  ;;  %v2282_v9 = vld [vmem:[%s3020_s3 + $0x28] sm:$0xff]  ;;  %v148_v10 = vld [vmem:[%s3020_s3] sm:$0xff]  ;;  %vm130_vm4 = vcmask 261120   ;;  %v2291_v32 = vld [vmem:[%s3020_s3 + $0x58] sm:$0xff]  ;;  %vm232_vm5 = vcmask 24576   ;;  %vm572_vm7 = vcmask 27648  }
   0x7   :  { %2423 = vmatpush3.msra.mxu0 %v2284_v5  ;;  %2413 = vmatprep.subr.mxu1 %v2682_v3  ;;  %v2281_v11 = vld [vmem:[%s3020_s3 + $0x20] sm:$0xff]  ;;  %v2298_v33 = vld [vmem:[%s3020_s3 + $0x78] sm:$0xff]  ;;  %v2290_v34 = vld [vmem:[%s3020_s3 + $0x50] sm:$0xff] }
   0x8   :  { %2424 = vmatprep.subr.mxu0 %v2682_v3  ;;  %2414 = vmatpush3.msra.mxu1 %v150_v6  ;;  %v2275_v12 = vld [vmem:[%s3019_s2] ss:$0 sm:$0xff]  ;;  %v2297_v35 = vld [vmem:[%s3020_s3 + $0x70] sm:$0xff]  ;;  %v2289_v36 = vld [vmem:[%s3020_s3 + $0x48] sm:$0xff] }
   0x9   :  { %2425 = vmatpush3.msra.mxu0 %v2283_v7  ;;  %2415 = vmatprep.subr.mxu1 %v2682_v3  ;;  %v2296_v37 = vld [vmem:[%s3020_s3 + $0x68] sm:$0xff]  ;;  %v2288_v38 = vld [vmem:[%s3020_s3 + $0x40] sm:$0xff]  ;;  %v488_v7 = vlaneseq }
   0xa   :  { %2426 = vmatprep.subr.mxu0 %v2682_v3  ;;  %2416 = vmatpush3.msra.mxu1 %v149_v8  ;;  %v2295_v39 = vld [vmem:[%s3020_s3 + $0x60] sm:$0xff] }
   0xb   :  { %2427 = vmatpush3.msra.mxu0 %v2282_v9  ;;  %2417 = vmatprep.subr.mxu1 %v2682_v3  ;;  %v152_v40 = vld [vmem:[%s3021_s4] sm:$0x1]  ;;  %v2285_v41 = vld [vmem:[%s3021_s4 + $0x1] sm:$0x1]  ;;  %v2292_v50 = vld [vmem:[%s3021_s4 + $0x2] sm:$0x1] }
   0xc   :  { %2428 = vmatprep.subr.mxu0 %v2682_v3  ;;  %2418 = vmatpush3.msra.mxu1 %v148_v10  ;;  %v129_v27 = vld [vmem:[#allocation2] sm:$0x1]  ;;  %v2299_v51 = vld [vmem:[%s3021_s4 + $0x3] sm:$0x1]  ;;  %v489_v10 = vshrl.u32 %v488_v7, 7  ;;  %s2684_s4 = smov [#allocation3]  }
   0xd   :  { %2429 = vmatpush3.msra.mxu0 %v2281_v11  ;;  %2419 = vmatprep.mubr.msk.f32.mxu1 %vm2683_vm3, %v2682_v3  ;;  %v491_v11 = vand.u32 127, %v488_v7  ;;  %s2240_s20 = sshll.u32 %s2684_s4, 4  ;;  %s2241_s20 = int_to_ptr.vmem [resolvable:$true] %s2240_s20 }
   0xe   :  { %2430 = vmatprep.mubr.msk.f32.mxu0 %vm2683_vm3, %v2682_v3  ;;  %2433 = vmatprep.subr.mxu1 %v2682_v3  ;;  %s2618_s21 = scalar_lea.vmem %s2241_s20, 64  ;;  %p2623_p1 = scmp.lt.s32.totalorder %s2241_s20, %s2241_s20 }
   0xf   :  { %2444 = vmatprep.subr.mxu0 %v2682_v3  ;;  %vm492_vm6 = vcmp.eq.s32.totalorder %v489_v10, %v491_v11  ;;  %p2619_p0 = scmp.ne.s32.totalorder %s2241_s20, %s2618_s21  ;;  %p2624_p2 = scmp.lt.s32.totalorder %s2618_s21, %s2618_s21 }
  0x11   :  { %p2625_p3 = por %p2624_p2, %p2623_p1 }
  0x13   :  { %p2626_p4 = pnand %p2625_p3, %p2619_p0 }
  0xc5   :  { %v2410_v13 = vpop.f32.mrf.mxu0 }
  0xc6   :  { %v124_v14 = vadd.f32 %v2410_v13, %v2275_v12 }
  0xc7   :  { %v118_v15 = vpop.f32.mrf.mxu0 }
  0xc8   :  { %v128_v16 = vmax.f32 %v124_v14, 0.0  ;;  %v119_v17 = vadd.f32 %v2275_v12, %v118_v15  ;;  %v2849_v14 = vsel %vm492_vm6, 1.0, %v2682_v3 }
  0xca   :  { %v127_v18 = vmax.f32 %v119_v17, 0.0  ;;  %v132_v19 = vsel %vm130_vm4, %v128_v16, 0.0 }
  0xcc   :  { %v131_v20 = vsel %vm130_vm4, %v127_v18, 0.0 }
  0xcd   :  { %v133_v21 = vadd.f32 %v132_v19, %v131_v20 }
  0xcf   :  { %v134_v22 = vrot.slane %v133_v21, 4 }
  0xd1   :  { %v135_v23 = vadd.f32 %v134_v22, %v133_v21 }
  0xd3   :  { %v136_v24 = vrot.slane %v135_v23, 2 }
  0xd5   :  { %v137_v25 = vadd.f32 %v136_v24, %v135_v23 }
  0xd7   :  { %v138_v26 = vrot.slane %v137_v25, 1 }
  0xd9   :  { %v139_v28 = vadd.f32 %v138_v26, %v137_v25 }
  0xdb   :  { %v140_v29 = vadd.f32 %v139_v28, %v129_v27 }
  0xdd   :  { %142 = vst.msk [vmem:[#allocation2] sm:$0x1] %vm29_vm2, %v140_v29 }
  0xe4   :  { %v146_v30 = vld [vmem:[#allocation2] sm:$0x1] }
  0xe5   :  { %v147_v31 = vmul.f32 0.0625, %v146_v30 }
  0xe7   :  { %2420 = vmatmul.mubr.msk.f32.vlgmr.msra.gmra.mxu1 %vm130_vm4, %v147_v31  ;;  %2431 = vmatmul.mubr.msk.f32.vlgmr.msra.gmra.mxu0 %vm130_vm4, %v147_v31 }
  0xe8   :  { %2434 = vmatpush3.msra.mxu1 %v2291_v32  ;;  %2445 = vmatpush3.msra.mxu0 %v2298_v33 }
  0xe9   :  { %2435 = vmatprep.subr.mxu1 %v2682_v3  ;;  %2446 = vmatprep.subr.mxu0 %v2682_v3 }
  0xea   :  { %2436 = vmatpush3.msra.mxu1 %v2290_v34  ;;  %2447 = vmatpush3.msra.mxu0 %v2297_v35 }
  0xeb   :  { %2437 = vmatprep.subr.mxu1 %v2682_v3  ;;  %2448 = vmatprep.subr.mxu0 %v2682_v3 }
  0xec   :  { %2438 = vmatpush3.msra.mxu1 %v2289_v36  ;;  %2449 = vmatpush3.msra.mxu0 %v2296_v37 }
  0xed   :  { %2439 = vmatprep.subr.mxu1 %v2682_v3  ;;  %2450 = vmatprep.subr.mxu0 %v2682_v3 }
  0xee   :  { %2440 = vmatpush3.msra.mxu1 %v2288_v38  ;;  %2441 = vmatprep.mubr.msk.f32.mxu1 %vm2683_vm3, %v2682_v3 }
  0xef   :  { %2451 = vmatpush3.msra.mxu0 %v2295_v39  ;;  %2452 = vmatprep.mubr.msk.f32.mxu0 %vm2683_vm3, %v2682_v3 }
  0xf0   :  { %2442 = vmatmul.mubr.msk.f32.vlgmr.msra.gmra.mxu1 %vm130_vm4, %v147_v31  ;;  %2453 = vmatmul.mubr.msk.f32.vlgmr.msra.gmra.mxu0 %vm130_vm4, %v147_v31 }
  0xf1   :  { %2455 = vmatprep.subr.mxu1 %v2682_v3  ;;  %2460 = vmatprep.subr.mxu0 %v2682_v3 }
  0xf2   :  { %2457 = vmatprep.mubr.msk.f32.mxu1 %vm2683_vm3, %v2682_v3  ;;  %2462 = vmatprep.mubr.msk.f32.mxu0 %vm2683_vm3, %v2682_v3 }
 0x1a7   :  { %v222_v42 = vpop.f32.mrf.mxu1  ;;  %v307_v43 = vpop.f32.mrf.mxu0 }
 0x1a8   :  { %v223_v44 = vadd.f32 %v222_v42, %v152_v40  ;;  %v308_v45 = vadd.f32 %v2285_v41, %v307_v43 }
 0x1a9   :  { %v2421_v46 = vpop.f32.mrf.mxu1  ;;  %v2432_v47 = vpop.f32.mrf.mxu0 }
 0x1aa   :  { %v2280_v48 = vmul.f32 -1.442695, %v223_v44  ;;  %v2287_v49 = vmul.f32 -1.442695, %v308_v45 }
 0x1ac   :  { %2602 = vpow2.f32 %v2280_v48 }
 0x1ad   :  { %2604 = vpow2.f32 %v2287_v49 }
 0x1b0   :  { %v391_v52 = vpop.f32.mrf.mxu1  ;;  %v475_v53 = vpop.f32.mrf.mxu0 }
 0x1b1   :  { %v392_v54 = vadd.f32 %v2292_v50, %v391_v52  ;;  %v476_v55 = vadd.f32 %v2299_v51, %v475_v53 }
 0x1b2   :  { %v2443_v56 = vpop.f32.mrf.mxu1  ;;  %v2454_v57 = vpop.f32.mrf.mxu0 }
 0x1b3   :  { %v2294_v58 = vmul.f32 -1.442695, %v392_v54  ;;  %v2301_v59 = vmul.f32 -1.442695, %v476_v55 }
 0x1b5   :  { %2606 = vpow2.f32 %v2294_v58 }
 0x1b6   :  { %2608 = vpow2.f32 %v2301_v59 }
 0x1b9   :  { %v2603_v60 = vpop.eup %2602 }
 0x1ba   :  { %v2605_v61 = vpop.eup %2604  ;;  %v229_v62 = vadd.f32 1.0, %v2603_v60 }
 0x1bb   :  { %v314_v63 = vadd.f32 1.0, %v2605_v61 }
 0x1bc   :  { %2610 = vrcp.f32 %v229_v62 }
 0x1bd   :  { %2612 = vrcp.f32 %v314_v63 }
 0x1c2   :  { %v2607_v0 = vpop.eup %2606 }
 0x1c3   :  { %v2609_v1 = vpop.eup %2608  ;;  %v398_v2 = vadd.f32 1.0, %v2607_v0 }
 0x1c4   :  { %v482_v4 = vadd.f32 1.0, %v2609_v1 }
 0x1c5   :  { %2614 = vrcp.f32 %v398_v2 }
 0x1c6   :  { %2616 = vrcp.f32 %v482_v4 }
 0x1c9   :  { %v2611_v5 = vpop.eup %2610 }
 0x1ca   :  { %v2613_v6 = vpop.eup %2612  ;;  %233 = vst.msk [vmem:[#allocation3] sm:$0x1] %vm232_vm5, %v2611_v5 }
 0x1cb   :  { %317 = vst.msk [vmem:[#allocation3 + $0x1] sm:$0x1] %vm232_vm5, %v2613_v6 }
 0x1d2   :  { %v2615_v8 = vpop.eup %2614 }
 0x1d3   :  { %v2617_v9 = vpop.eup %2616  ;;  %401 = vst.msk [vmem:[#allocation3 + $0x2] sm:$0x1] %vm232_vm5, %v2615_v8 }
 0x1d4   :  { %485 = vst.msk [vmem:[#allocation3 + $0x3] sm:$0x1] %vm232_vm5, %v2617_v9 }
 0x1db   :  { %v2842_v12 = vld [vmem:[#allocation3] sm:$0xf] }
 0x1dc   :  { %v2846_v13 = vmul.f32 %v2842_v12, %v2842_v12 }
 0x1de   :  { %2456 = vmatpush3.msk.msra.mxu1 %vm48_vm0, %v2846_v13  ;;  %2461 = vmatpush3.msk.msra.mxu0 %vm48_vm0, %v2846_v13 }
 0x1df   :  { %2458 = vmatmul.mubr.msk.f32.vlgmr.msra.gmra.mxu1 %vm41_vm1, %v2849_v14  ;;  %2465 = vmatprep.subr.mxu1 %v2682_v3 }
 0x1e0   :  { %2466 = vmatpush3.msk.msra.mxu1 %vm48_vm0, %v2846_v13  ;;  %2470 = vmatprep.subr.mxu0 %v2682_v3 }
 0x1e1   :  { %2467 = vmatprep.mubr.msk.f32.mxu1 %vm2683_vm3, %v2682_v3  ;;  %2475 = vmatprep.subr.mxu1 %v2682_v3 }
 0x29f   :  { %v567_v15 = vpop.f32.mrf.mxu1 }
 0x2a0   :  { %2463 = vmatmul.mubr.msk.f32.vlgmr.msra.gmra.mxu0 %vm41_vm1, %v567_v15  ;;  %v571_v16 = vmul.f32 %v2849_v14, %v567_v15 }
 0x2a1   :  { %2471 = vmatpush3.msk.msra.mxu0 %vm48_vm0, %v2846_v13  ;;  %v2459_v17 = vpop.f32.mrf.mxu1  ;;  %2472 = vmatprep.mubr.msk.f32.mxu0 %vm2683_vm3, %v2682_v3 }
 0x2a2   :  { %v573_v18 = vsel %vm572_vm7, %v571_v16, 0.0  ;;  %2480 = vmatprep.subr.mxu0 %v2682_v3 }
 0x2a3   :  { %574 = vadd.xlane.f32.xlu0 %v573_v18 }
 0x32c   :  { %v575_v19 = vpop.xlane.xlu0 %574 }
 0x32d   :  { %v576_v20 = vrot.slane %v575_v19, 4 }
 0x32f   :  { %v577_v21 = vadd.f32 %v576_v20, %v575_v19 }
 0x331   :  { %v578_v22 = vrot.slane %v577_v21, 2 }
 0x333   :  { %v579_v23 = vadd.f32 %v578_v22, %v577_v21 }
 0x335   :  { %v580_v24 = vrot.slane %v579_v23, 1 }
 0x337   :  { %v581_v25 = vadd.f32 %v580_v24, %v579_v23 }
 0x339   :  { %2555 = vpush %v581_v25 }
 0x360   :  { %v653_v26 = vpop.f32.mrf.mxu0 }
 0x361   :  { %v657_v27 = vmul.f32 0.5, %v653_v26 }
 0x362   :  { %v2464_v28 = vpop.f32.mrf.mxu0 }
 0x363   :  { %2468 = vmatmul.mubr.msk.f32.vlgmr.msra.gmra.mxu1 %vm41_vm1, %v657_v27  ;;  %v658_v29 = vmul.f32 %v2849_v14, %v657_v27 }
 0x364   :  { %2476 = vmatpush3.msk.msra.mxu1 %vm48_vm0, %v2846_v13  ;;  %2477 = vmatprep.mubr.msk.f32.mxu1 %vm2683_vm3, %v2682_v3 }
 0x365   :  { %v659_v30 = vsel %vm572_vm7, %v658_v29, 0.0  ;;  %2485 = vmatprep.subr.mxu1 %v2682_v3 }
 0x366   :  { %660 = vadd.xlane.f32.xlu0 %v659_v30 }
 0x3ef   :  { %v661_v31 = vpop.xlane.xlu0 %660 }
 0x3f0   :  { %v662_v32 = vrot.slane %v661_v31, 4 }
 0x3f2   :  { %v663_v33 = vadd.f32 %v662_v32, %v661_v31 }
 0x3f4   :  { %v664_v34 = vrot.slane %v663_v33, 2 }
 0x3f6   :  { %v665_v35 = vadd.f32 %v664_v34, %v663_v33 }
 0x3f8   :  { %v666_v36 = vrot.slane %v665_v35, 1 }
 0x3fa   :  { %v667_v37 = vadd.f32 %v666_v36, %v665_v35 }
 0x3fc   :  { %2557 = vpush %v667_v37 }
 0x423   :  { %v739_v38 = vpop.f32.mrf.mxu1 }
 0x424   :  { %v743_v39 = vmul.f32 0.33333334, %v739_v38 }
 0x425   :  { %v2469_v40 = vpop.f32.mrf.mxu1 }
 0x426   :  { %2473 = vmatmul.mubr.msk.f32.vlgmr.msra.gmra.mxu0 %vm41_vm1, %v743_v39  ;;  %v744_v41 = vmul.f32 %v2849_v14, %v743_v39 }
 0x427   :  { %2481 = vmatpush3.msk.msra.mxu0 %vm48_vm0, %v2846_v13  ;;  %2482 = vmatprep.mubr.msk.f32.mxu0 %vm2683_vm3, %v2682_v3 }
 0x428   :  { %v745_v42 = vsel %vm572_vm7, %v744_v41, 0.0  ;;  %2490 = vmatprep.subr.mxu0 %v2682_v3 }
 0x429   :  { %746 = vadd.xlane.f32.xlu1 %v745_v42 }
 0x4b2   :  { %v747_v43 = vpop.xlane.xlu1 %746 }
 0x4b3   :  { %v748_v44 = vrot.slane %v747_v43, 4 }
 0x4b5   :  { %v749_v45 = vadd.f32 %v748_v44, %v747_v43 }
 0x4b7   :  { %v750_v46 = vrot.slane %v749_v45, 2 }
 0x4b9   :  { %v751_v47 = vadd.f32 %v750_v46, %v749_v45 }
 0x4bb   :  { %v752_v48 = vrot.slane %v751_v47, 1 }
 0x4bd   :  { %v753_v49 = vadd.f32 %v752_v48, %v751_v47 }
 0x4bf   :  { %2559 = vpush %v753_v49 }
 0x4e6   :  { %v825_v50 = vpop.f32.mrf.mxu0 }
 0x4e7   :  { %v829_v51 = vmul.f32 0.25, %v825_v50 }
 0x4e8   :  { %v2474_v52 = vpop.f32.mrf.mxu0 }
 0x4e9   :  { %2478 = vmatmul.mubr.msk.f32.vlgmr.msra.gmra.mxu1 %vm41_vm1, %v829_v51  ;;  %v830_v53 = vmul.f32 %v2849_v14, %v829_v51 }
 0x4ea   :  { %2486 = vmatpush3.msk.msra.mxu1 %vm48_vm0, %v2846_v13  ;;  %2487 = vmatprep.mubr.msk.f32.mxu1 %vm2683_vm3, %v2682_v3 }
 0x4eb   :  { %v831_v54 = vsel %vm572_vm7, %v830_v53, 0.0  ;;  %2495 = vmatprep.subr.mxu1 %v2682_v3 }
 0x4ec   :  { %832 = vadd.xlane.f32.xlu1 %v831_v54 }
 0x575   :  { %v833_v55 = vpop.xlane.xlu1 %832 }
 0x576   :  { %v834_v56 = vrot.slane %v833_v55, 4 }
 0x578   :  { %v835_v57 = vadd.f32 %v834_v56, %v833_v55 }
 0x57a   :  { %v836_v58 = vrot.slane %v835_v57, 2 }
 0x57c   :  { %v837_v59 = vadd.f32 %v836_v58, %v835_v57 }
 0x57e   :  { %v838_v60 = vrot.slane %v837_v59, 1 }
 0x580   :  { %v839_v61 = vadd.f32 %v838_v60, %v837_v59 }
 0x582   :  { %2561 = vpush %v839_v61 }
 0x5a9   :  { %v911_v62 = vpop.f32.mrf.mxu1 }
 0x5aa   :  { %v915_v63 = vmul.f32 0.2, %v911_v62 }
 0x5ab   :  { %v2479_v0 = vpop.f32.mrf.mxu1 }
 0x5ac   :  { %2483 = vmatmul.mubr.msk.f32.vlgmr.msra.gmra.mxu0 %vm41_vm1, %v915_v63  ;;  %v916_v1 = vmul.f32 %v2849_v14, %v915_v63 }
 0x5ad   :  { %2491 = vmatpush3.msk.msra.mxu0 %vm48_vm0, %v2846_v13  ;;  %2492 = vmatprep.mubr.msk.f32.mxu0 %vm2683_vm3, %v2682_v3 }
 0x5ae   :  { %v917_v2 = vsel %vm572_vm7, %v916_v1, 0.0  ;;  %2500 = vmatprep.subr.mxu0 %v2682_v3 }
 0x5af   :  { %918 = vadd.xlane.f32.xlu0 %v917_v2 }
 0x638   :  { %v919_v4 = vpop.xlane.xlu0 %918 }
 0x639   :  { %v920_v5 = vrot.slane %v919_v4, 4 }
 0x63b   :  { %v921_v6 = vadd.f32 %v920_v5, %v919_v4 }
 0x63d   :  { %v922_v7 = vrot.slane %v921_v6, 2 }
 0x63f   :  { %v923_v8 = vadd.f32 %v922_v7, %v921_v6 }
 0x641   :  { %v924_v9 = vrot.slane %v923_v8, 1 }
 0x643   :  { %v925_v10 = vadd.f32 %v924_v9, %v923_v8 }
 0x645   :  { %2563 = vpush %v925_v10 }
 0x66c   :  { %v997_v11 = vpop.f32.mrf.mxu0 }
 0x66d   :  { %v1001_v15 = vmul.f32 0.16666667, %v997_v11 }
 0x66e   :  { %v2484_v16 = vpop.f32.mrf.mxu0 }
 0x66f   :  { %2488 = vmatmul.mubr.msk.f32.vlgmr.msra.gmra.mxu1 %vm41_vm1, %v1001_v15  ;;  %v1002_v17 = vmul.f32 %v2849_v14, %v1001_v15 }
 0x670   :  { %2496 = vmatpush3.msk.msra.mxu1 %vm48_vm0, %v2846_v13  ;;  %2497 = vmatprep.mubr.msk.f32.mxu1 %vm2683_vm3, %v2682_v3 }
 0x671   :  { %v1003_v18 = vsel %vm572_vm7, %v1002_v17, 0.0  ;;  %2505 = vmatprep.subr.mxu1 %v2682_v3 }
 0x672   :  { %1004 = vadd.xlane.f32.xlu1 %v1003_v18 }
 0x6fb   :  { %v1005_v19 = vpop.xlane.xlu1 %1004 }
 0x6fc   :  { %v1006_v20 = vrot.slane %v1005_v19, 4 }
 0x6fe   :  { %v1007_v21 = vadd.f32 %v1006_v20, %v1005_v19 }
 0x700   :  { %v1008_v22 = vrot.slane %v1007_v21, 2 }
 0x702   :  { %v1009_v23 = vadd.f32 %v1008_v22, %v1007_v21 }
 0x704   :  { %v1010_v24 = vrot.slane %v1009_v23, 1 }
 0x706   :  { %v1011_v25 = vadd.f32 %v1010_v24, %v1009_v23 }
 0x708   :  { %2565 = vpush %v1011_v25 }
 0x72f   :  { %v1083_v26 = vpop.f32.mrf.mxu1 }
 0x730   :  { %v1087_v27 = vmul.f32 0.14285715, %v1083_v26 }
 0x731   :  { %v2489_v28 = vpop.f32.mrf.mxu1 }
 0x732   :  { %2493 = vmatmul.mubr.msk.f32.vlgmr.msra.gmra.mxu0 %vm41_vm1, %v1087_v27  ;;  %v1088_v29 = vmul.f32 %v2849_v14, %v1087_v27 }
 0x733   :  { %2501 = vmatpush3.msk.msra.mxu0 %vm48_vm0, %v2846_v13  ;;  %2502 = vmatprep.mubr.msk.f32.mxu0 %vm2683_vm3, %v2682_v3 }
 0x734   :  { %v1089_v30 = vsel %vm572_vm7, %v1088_v29, 0.0  ;;  %2510 = vmatprep.subr.mxu0 %v2682_v3 }
 0x735   :  { %1090 = vadd.xlane.f32.xlu0 %v1089_v30 }
 0x7be   :  { %v1091_v31 = vpop.xlane.xlu0 %1090 }
 0x7bf   :  { %v1092_v32 = vrot.slane %v1091_v31, 4 }
 0x7c1   :  { %v1093_v33 = vadd.f32 %v1092_v32, %v1091_v31 }
 0x7c3   :  { %v1094_v34 = vrot.slane %v1093_v33, 2 }
 0x7c5   :  { %v1095_v35 = vadd.f32 %v1094_v34, %v1093_v33 }
 0x7c7   :  { %v1096_v36 = vrot.slane %v1095_v35, 1 }
 0x7c9   :  { %v1097_v37 = vadd.f32 %v1096_v36, %v1095_v35 }
 0x7cb   :  { %2567 = vpush %v1097_v37 }
 0x7f2   :  { %v1169_v38 = vpop.f32.mrf.mxu0 }
 0x7f3   :  { %v1173_v39 = vmul.f32 0.125, %v1169_v38 }
 0x7f4   :  { %v2494_v40 = vpop.f32.mrf.mxu0 }
 0x7f5   :  { %2498 = vmatmul.mubr.msk.f32.vlgmr.msra.gmra.mxu1 %vm41_vm1, %v1173_v39  ;;  %v1174_v41 = vmul.f32 %v2849_v14, %v1173_v39 }
 0x7f6   :  { %2506 = vmatpush3.msk.msra.mxu1 %vm48_vm0, %v2846_v13  ;;  %2507 = vmatprep.mubr.msk.f32.mxu1 %vm2683_vm3, %v2682_v3 }
 0x7f7   :  { %v1175_v42 = vsel %vm572_vm7, %v1174_v41, 0.0  ;;  %2515 = vmatprep.subr.mxu1 %v2682_v3 }
 0x7f8   :  { %1176 = vadd.xlane.f32.xlu1 %v1175_v42 }
 0x881   :  { %v1177_v43 = vpop.xlane.xlu1 %1176 }
 0x882   :  { %v1178_v44 = vrot.slane %v1177_v43, 4 }
 0x884   :  { %v1179_v45 = vadd.f32 %v1178_v44, %v1177_v43 }
 0x886   :  { %v1180_v46 = vrot.slane %v1179_v45, 2 }
 0x888   :  { %v1181_v47 = vadd.f32 %v1180_v46, %v1179_v45 }
 0x88a   :  { %v1182_v48 = vrot.slane %v1181_v47, 1 }
 0x88c   :  { %v1183_v49 = vadd.f32 %v1182_v48, %v1181_v47 }
 0x88e   :  { %2569 = vpush %v1183_v49 }
 0x8b5   :  { %v1255_v50 = vpop.f32.mrf.mxu1 }
 0x8b6   :  { %v1259_v51 = vmul.f32 0.11111111, %v1255_v50 }
 0x8b7   :  { %v2499_v52 = vpop.f32.mrf.mxu1 }
 0x8b8   :  { %2503 = vmatmul.mubr.msk.f32.vlgmr.msra.gmra.mxu0 %vm41_vm1, %v1259_v51  ;;  %v1260_v53 = vmul.f32 %v2849_v14, %v1259_v51 }
 0x8b9   :  { %2511 = vmatpush3.msk.msra.mxu0 %vm48_vm0, %v2846_v13  ;;  %2512 = vmatprep.mubr.msk.f32.mxu0 %vm2683_vm3, %v2682_v3 }
 0x8ba   :  { %v1261_v54 = vsel %vm572_vm7, %v1260_v53, 0.0  ;;  %2520 = vmatprep.subr.mxu0 %v2682_v3 }
 0x8bb   :  { %1262 = vadd.xlane.f32.xlu0 %v1261_v54 }
 0x944   :  { %v1263_v55 = vpop.xlane.xlu0 %1262 }
 0x945   :  { %v1264_v56 = vrot.slane %v1263_v55, 4 }
 0x947   :  { %v1265_v57 = vadd.f32 %v1264_v56, %v1263_v55 }
 0x949   :  { %v1266_v58 = vrot.slane %v1265_v57, 2 }
 0x94b   :  { %v1267_v59 = vadd.f32 %v1266_v58, %v1265_v57 }
 0x94d   :  { %v1268_v60 = vrot.slane %v1267_v59, 1 }
 0x94f   :  { %v1269_v61 = vadd.f32 %v1268_v60, %v1267_v59 }
 0x951   :  { %2571 = vpush %v1269_v61 }
 0x978   :  { %v1341_v62 = vpop.f32.mrf.mxu0 }
 0x979   :  { %v1345_v63 = vmul.f32 0.1, %v1341_v62 }
 0x97a   :  { %v2504_v0 = vpop.f32.mrf.mxu0 }
 0x97b   :  { %2508 = vmatmul.mubr.msk.f32.vlgmr.msra.gmra.mxu1 %vm41_vm1, %v1345_v63  ;;  %v1346_v1 = vmul.f32 %v2849_v14, %v1345_v63 }
 0x97c   :  { %2516 = vmatpush3.msk.msra.mxu1 %vm48_vm0, %v2846_v13  ;;  %2517 = vmatprep.mubr.msk.f32.mxu1 %vm2683_vm3, %v2682_v3 }
 0x97d   :  { %v1347_v2 = vsel %vm572_vm7, %v1346_v1, 0.0  ;;  %2525 = vmatprep.subr.mxu1 %v2682_v3 }
 0x97e   :  { %1348 = vadd.xlane.f32.xlu1 %v1347_v2 }
 0xa07   :  { %v1349_v4 = vpop.xlane.xlu1 %1348 }
 0xa08   :  { %v1350_v5 = vrot.slane %v1349_v4, 4 }
 0xa0a   :  { %v1351_v6 = vadd.f32 %v1350_v5, %v1349_v4 }
 0xa0c   :  { %v1352_v7 = vrot.slane %v1351_v6, 2 }
 0xa0e   :  { %v1353_v8 = vadd.f32 %v1352_v7, %v1351_v6 }
 0xa10   :  { %v1354_v9 = vrot.slane %v1353_v8, 1 }
 0xa12   :  { %v1355_v10 = vadd.f32 %v1354_v9, %v1353_v8 }
 0xa14   :  { %2573 = vpush %v1355_v10 }
 0xa3b   :  { %v1427_v11 = vpop.f32.mrf.mxu1 }
 0xa3c   :  { %v1431_v15 = vmul.f32 0.09090909, %v1427_v11 }
 0xa3d   :  { %v2509_v16 = vpop.f32.mrf.mxu1 }
 0xa3e   :  { %2513 = vmatmul.mubr.msk.f32.vlgmr.msra.gmra.mxu0 %vm41_vm1, %v1431_v15  ;;  %v1432_v17 = vmul.f32 %v2849_v14, %v1431_v15 }
 0xa3f   :  { %2521 = vmatpush3.msk.msra.mxu0 %vm48_vm0, %v2846_v13  ;;  %2522 = vmatprep.mubr.msk.f32.mxu0 %vm2683_vm3, %v2682_v3 }
 0xa40   :  { %v1433_v18 = vsel %vm572_vm7, %v1432_v17, 0.0  ;;  %2530 = vmatprep.subr.mxu0 %v2682_v3 }
 0xa41   :  { %1434 = vadd.xlane.f32.xlu0 %v1433_v18 }
 0xaca   :  { %v1435_v19 = vpop.xlane.xlu0 %1434 }
 0xacb   :  { %v1436_v20 = vrot.slane %v1435_v19, 4 }
 0xacd   :  { %v1437_v21 = vadd.f32 %v1436_v20, %v1435_v19 }
 0xacf   :  { %v1438_v22 = vrot.slane %v1437_v21, 2 }
 0xad1   :  { %v1439_v23 = vadd.f32 %v1438_v22, %v1437_v21 }
 0xad3   :  { %v1440_v24 = vrot.slane %v1439_v23, 1 }
 0xad5   :  { %v1441_v25 = vadd.f32 %v1440_v24, %v1439_v23 }
 0xad7   :  { %2575 = vpush %v1441_v25 }
 0xafe   :  { %v1513_v26 = vpop.f32.mrf.mxu0 }
 0xaff   :  { %v1517_v27 = vmul.f32 0.083333336, %v1513_v26 }
 0xb00   :  { %v2514_v28 = vpop.f32.mrf.mxu0 }
 0xb01   :  { %2518 = vmatmul.mubr.msk.f32.vlgmr.msra.gmra.mxu1 %vm41_vm1, %v1517_v27  ;;  %v1518_v29 = vmul.f32 %v2849_v14, %v1517_v27 }
 0xb02   :  { %2526 = vmatpush3.msk.msra.mxu1 %vm48_vm0, %v2846_v13  ;;  %2527 = vmatprep.mubr.msk.f32.mxu1 %vm2683_vm3, %v2682_v3 }
 0xb03   :  { %v1519_v30 = vsel %vm572_vm7, %v1518_v29, 0.0  ;;  %2535 = vmatprep.subr.mxu1 %v2682_v3 }
 0xb04   :  { %1520 = vadd.xlane.f32.xlu1 %v1519_v30 }
 0xb8d   :  { %v1521_v31 = vpop.xlane.xlu1 %1520 }
 0xb8e   :  { %v1522_v32 = vrot.slane %v1521_v31, 4 }
 0xb90   :  { %v1523_v33 = vadd.f32 %v1522_v32, %v1521_v31 }
 0xb92   :  { %v1524_v34 = vrot.slane %v1523_v33, 2 }
 0xb94   :  { %v1525_v35 = vadd.f32 %v1524_v34, %v1523_v33 }
 0xb96   :  { %v1526_v36 = vrot.slane %v1525_v35, 1 }
 0xb98   :  { %v1527_v37 = vadd.f32 %v1526_v36, %v1525_v35 }
 0xb9a   :  { %2577 = vpush %v1527_v37 }
 0xbc1   :  { %v1599_v38 = vpop.f32.mrf.mxu1 }
 0xbc2   :  { %v1603_v39 = vmul.f32 0.07692308, %v1599_v38 }
 0xbc3   :  { %v2519_v40 = vpop.f32.mrf.mxu1 }
 0xbc4   :  { %2523 = vmatmul.mubr.msk.f32.vlgmr.msra.gmra.mxu0 %vm41_vm1, %v1603_v39  ;;  %v1604_v41 = vmul.f32 %v2849_v14, %v1603_v39 }
 0xbc5   :  { %2531 = vmatpush3.msk.msra.mxu0 %vm48_vm0, %v2846_v13  ;;  %2532 = vmatprep.mubr.msk.f32.mxu0 %vm2683_vm3, %v2682_v3 }
 0xbc6   :  { %v1605_v42 = vsel %vm572_vm7, %v1604_v41, 0.0  ;;  %2540 = vmatprep.subr.mxu0 %v2682_v3 }
 0xbc7   :  { %1606 = vadd.xlane.f32.xlu0 %v1605_v42 }
 0xc50   :  { %v1607_v43 = vpop.xlane.xlu0 %1606 }
 0xc51   :  { %v1608_v44 = vrot.slane %v1607_v43, 4 }
 0xc53   :  { %v1609_v45 = vadd.f32 %v1608_v44, %v1607_v43 }
 0xc55   :  { %v1610_v46 = vrot.slane %v1609_v45, 2 }
 0xc57   :  { %v1611_v47 = vadd.f32 %v1610_v46, %v1609_v45 }
 0xc59   :  { %v1612_v48 = vrot.slane %v1611_v47, 1 }
 0xc5b   :  { %v1613_v49 = vadd.f32 %v1612_v48, %v1611_v47 }
 0xc5d   :  { %2579 = vpush %v1613_v49 }
 0xc84   :  { %v1685_v50 = vpop.f32.mrf.mxu0 }
 0xc85   :  { %v1689_v51 = vmul.f32 0.071428575, %v1685_v50 }
 0xc86   :  { %v2524_v52 = vpop.f32.mrf.mxu0 }
 0xc87   :  { %2528 = vmatmul.mubr.msk.f32.vlgmr.msra.gmra.mxu1 %vm41_vm1, %v1689_v51  ;;  %v1690_v53 = vmul.f32 %v2849_v14, %v1689_v51 }
 0xc88   :  { %2536 = vmatpush3.msk.msra.mxu1 %vm48_vm0, %v2846_v13  ;;  %2537 = vmatprep.mubr.msk.f32.mxu1 %vm2683_vm3, %v2682_v3 }
 0xc89   :  { %v1691_v54 = vsel %vm572_vm7, %v1690_v53, 0.0  ;;  %2545 = vmatprep.subr.mxu1 %v2682_v3  ;;  %v2221_v53 = vand.u32 2147483647, %v2842_v12 }
 0xc8a   :  { %1692 = vadd.xlane.f32.xlu1 %v1691_v54 }
 0xc8b   :  { %v2222_v54 = vsel %vm572_vm7, %v2221_v53, 0.0 }
 0xd13   :  { %v1693_v55 = vpop.xlane.xlu1 %1692 }
 0xd14   :  { %v1694_v56 = vrot.slane %v1693_v55, 4 }
 0xd16   :  { %v1695_v57 = vadd.f32 %v1694_v56, %v1693_v55 }
 0xd18   :  { %v1696_v58 = vrot.slane %v1695_v57, 2 }
 0xd1a   :  { %v1697_v59 = vadd.f32 %v1696_v58, %v1695_v57 }
 0xd1c   :  { %v1698_v60 = vrot.slane %v1697_v59, 1 }
 0xd1e   :  { %v1699_v61 = vadd.f32 %v1698_v60, %v1697_v59 }
 0xd20   :  { %2581 = vpush %v1699_v61 }
 0xd47   :  { %v1771_v62 = vpop.f32.mrf.mxu1 }
 0xd48   :  { %v1775_v63 = vmul.f32 0.06666667, %v1771_v62 }
 0xd49   :  { %v2529_v0 = vpop.f32.mrf.mxu1 }
 0xd4a   :  { %2533 = vmatmul.mubr.msk.f32.vlgmr.msra.gmra.mxu0 %vm41_vm1, %v1775_v63  ;;  %v1776_v1 = vmul.f32 %v2849_v14, %v1775_v63 }
 0xd4b   :  { %2541 = vmatpush3.msk.msra.mxu0 %vm48_vm0, %v2846_v13  ;;  %2542 = vmatprep.mubr.msk.f32.mxu0 %vm2683_vm3, %v2682_v3 }
 0xd4c   :  { %v1777_v2 = vsel %vm572_vm7, %v1776_v1, 0.0  ;;  %2550 = vmatprep.subr.mxu0 %v2682_v3 }
 0xd4d   :  { %1778 = vadd.xlane.f32.xlu0 %v1777_v2 }
 0xdd6   :  { %v1779_v4 = vpop.xlane.xlu0 %1778 }
 0xdd7   :  { %v1780_v5 = vrot.slane %v1779_v4, 4 }
 0xdd9   :  { %v1781_v6 = vadd.f32 %v1780_v5, %v1779_v4 }
 0xddb   :  { %v1782_v7 = vrot.slane %v1781_v6, 2 }
 0xddd   :  { %v1783_v8 = vadd.f32 %v1782_v7, %v1781_v6 }
 0xddf   :  { %v1784_v9 = vrot.slane %v1783_v8, 1 }
 0xde1   :  { %v1785_v10 = vadd.f32 %v1784_v9, %v1783_v8 }
 0xde3   :  { %2583 = vpush %v1785_v10 }
 0xe0a   :  { %v1857_v11 = vpop.f32.mrf.mxu0 }
 0xe0b   :  { %v1861_v15 = vmul.f32 0.0625, %v1857_v11 }
 0xe0c   :  { %v2534_v16 = vpop.f32.mrf.mxu0 }
 0xe0d   :  { %2538 = vmatmul.mubr.msk.f32.vlgmr.msra.gmra.mxu1 %vm41_vm1, %v1861_v15  ;;  %v1862_v17 = vmul.f32 %v2849_v14, %v1861_v15 }
 0xe0e   :  { %2546 = vmatpush3.msk.msra.mxu1 %vm48_vm0, %v2846_v13  ;;  %2547 = vmatprep.mubr.msk.f32.mxu1 %vm2683_vm3, %v2682_v3 }
 0xe0f   :  { %v1863_v18 = vsel %vm572_vm7, %v1862_v17, 0.0 }
 0xe10   :  { %1864 = vadd.xlane.f32.xlu1 %v1863_v18 }
 0xe99   :  { %v1865_v19 = vpop.xlane.xlu1 %1864 }
 0xe9a   :  { %v1866_v20 = vrot.slane %v1865_v19, 4 }
 0xe9c   :  { %v1867_v21 = vadd.f32 %v1866_v20, %v1865_v19 }
 0xe9e   :  { %v1868_v22 = vrot.slane %v1867_v21, 2 }
 0xea0   :  { %v1869_v23 = vadd.f32 %v1868_v22, %v1867_v21 }
 0xea2   :  { %v1870_v24 = vrot.slane %v1869_v23, 1 }
 0xea4   :  { %v1871_v25 = vadd.f32 %v1870_v24, %v1869_v23 }
 0xea6   :  { %2585 = vpush %v1871_v25 }
 0xecd   :  { %v1943_v26 = vpop.f32.mrf.mxu1 }
 0xece   :  { %v1947_v27 = vmul.f32 0.05882353, %v1943_v26 }
 0xecf   :  { %v2539_v28 = vpop.f32.mrf.mxu1 }
 0xed0   :  { %2543 = vmatmul.mubr.msk.f32.vlgmr.msra.gmra.mxu0 %vm41_vm1, %v1947_v27  ;;  %v1948_v29 = vmul.f32 %v2849_v14, %v1947_v27 }
 0xed1   :  { %2551 = vmatpush3.msk.msra.mxu0 %vm48_vm0, %v2846_v13  ;;  %2552 = vmatprep.mubr.msk.f32.mxu0 %vm2683_vm3, %v2682_v3 }
 0xed2   :  { %v1949_v30 = vsel %vm572_vm7, %v1948_v29, 0.0 }
 0xed3   :  { %1950 = vadd.xlane.f32.xlu0 %v1949_v30 }
 0xf5c   :  { %v1951_v31 = vpop.xlane.xlu0 %1950 }
 0xf5d   :  { %v1952_v32 = vrot.slane %v1951_v31, 4 }
 0xf5f   :  { %v1953_v33 = vadd.f32 %v1952_v32, %v1951_v31 }
 0xf61   :  { %v1954_v34 = vrot.slane %v1953_v33, 2 }
 0xf63   :  { %v1955_v35 = vadd.f32 %v1954_v34, %v1953_v33 }
 0xf65   :  { %v1956_v36 = vrot.slane %v1955_v35, 1 }
 0xf67   :  { %v1957_v37 = vadd.f32 %v1956_v36, %v1955_v35 }
 0xf69   :  { %2587 = vpush %v1957_v37 }
 0xf90   :  { %v2029_v38 = vpop.f32.mrf.mxu0 }
 0xf91   :  { %v2033_v39 = vmul.f32 0.055555556, %v2029_v38 }
 0xf92   :  { %v2544_v40 = vpop.f32.mrf.mxu0 }
 0xf93   :  { %2548 = vmatmul.mubr.msk.f32.vlgmr.msra.gmra.mxu1 %vm41_vm1, %v2033_v39  ;;  %v2034_v13 = vmul.f32 %v2849_v14, %v2033_v39 }
 0xf95   :  { %v2035_v3 = vsel %vm572_vm7, %v2034_v13, 0.0 }
 0xf96   :  { %2036 = vadd.xlane.f32.xlu1 %v2035_v3 }
0x101f   :  { %v2037_v41 = vpop.xlane.xlu1 %2036 }
0x1020   :  { %v2038_v42 = vrot.slane %v2037_v41, 4 }
0x1022   :  { %v2039_v43 = vadd.f32 %v2038_v42, %v2037_v41 }
0x1024   :  { %v2040_v44 = vrot.slane %v2039_v43, 2 }
0x1026   :  { %v2041_v45 = vadd.f32 %v2040_v44, %v2039_v43 }
0x1028   :  { %v2042_v46 = vrot.slane %v2041_v45, 1 }
0x102a   :  { %v2043_v47 = vadd.f32 %v2042_v46, %v2041_v45 }
0x102c   :  { %2589 = vpush %v2043_v47 }
0x1053   :  { %v2115_v48 = vpop.f32.mrf.mxu1 }
0x1054   :  { %v2119_v49 = vmul.f32 0.05263158, %v2115_v48 }
0x1055   :  { %v2549_v50 = vpop.f32.mrf.mxu1 }
0x1056   :  { %2553 = vmatmul.mubr.msk.f32.vlgmr.msra.gmra.mxu0 %vm41_vm1, %v2119_v49  ;;  %v2120_v51 = vmul.f32 %v2849_v14, %v2119_v49 }
0x1058   :  { %v2121_v52 = vsel %vm572_vm7, %v2120_v51, 0.0 }
0x1059   :  { %2122 = vadd.xlane.f32.xlu0 %v2121_v52 }
0x105d   :  { %2223 = vadd.xlane.f32.xlu0 %v2222_v54 }
0x10e2   :  { %v2123_v55 = vpop.xlane.xlu0 %2122 }
0x10e3   :  { %v2124_v56 = vrot.slane %v2123_v55, 4 }
0x10e5   :  { %v2125_v57 = vadd.f32 %v2124_v56, %v2123_v55 }
0x10e7   :  { %v2126_v58 = vrot.slane %v2125_v57, 2 }
0x10e9   :  { %v2127_v59 = vadd.f32 %v2126_v58, %v2125_v57 }
0x10eb   :  { %v2128_v60 = vrot.slane %v2127_v59, 1 }
0x10ed   :  { %v2129_v61 = vadd.f32 %v2128_v60, %v2127_v59 }
0x10ef   :  { %2591 = vpush %v2129_v61 }
0x1116   :  { %v2201_v62 = vpop.f32.mrf.mxu0 }
0x1117   :  { %v2205_v63 = vmul.f32 0.05, %v2201_v62 }
0x1118   :  { %v2554_v0 = vpop.f32.mrf.mxu0 }
0x1119   :  { %v2206_v1 = vmul.f32 %v2849_v14, %v2205_v63 }
0x111b   :  { %v2207_v2 = vsel %vm572_vm7, %v2206_v1, 0.0 }
0x111c   :  { %2208 = vadd.xlane.f32.xlu1 %v2207_v2 }
0x111d   :  { %2629 = shalt.err (!%p2626_p4)
}
0x111e   :  { %2243 = dma.vmem_to_hbm [thread:$0]  %s2241_s20, 64, %s3022_s5, [#allocation4]   ;;  %v2224_v12 = vpop.xlane.xlu0 %2223  ;;  %vm2219_vm8 = vcmask 0  }
0x111f   :  { %v2225_v4 = vrot.slane %v2224_v12, 4  ;;  %s2556_s23 = spop %2555 }
0x1120   :  { %s2558_s24 = spop %2557 }
0x1121   :  { %v2226_v14 = vadd.f32 %v2225_v4, %v2224_v12  ;;  %s2560_s25 = spop %2559  ;;  %s669_s5 = sadd.f32 %s2558_s24, %s2556_s23 }
0x1122   :  { %s2562_s26 = spop %2561 }
0x1123   :  { %v2227_v5 = vrot.slane %v2226_v14, 2  ;;  %s755_s27 = sadd.f32 %s2560_s25, %s669_s5  ;;  %s2564_s28 = spop %2563 }
0x1124   :  { %s2566_s1 = spop %2565 }
0x1125   :  { %v2228_v9 = vadd.f32 %v2227_v5, %v2226_v14  ;;  %s841_s29 = sadd.f32 %s2562_s26, %s755_s27  ;;  %s2568_s30 = spop %2567 }
0x1126   :  { %s2570_s9 = spop %2569 }
0x1127   :  { %v2229_v15 = vrot.slane %v2228_v9, 1  ;;  %s927_s0 = sadd.f32 %s2564_s28, %s841_s29  ;;  %s2572_s11 = spop %2571 }
0x1128   :  { %s2574_s3 = spop %2573 }
0x1129   :  { %v2230_v18 = vadd.f32 %v2229_v15, %v2228_v9  ;;  %s1013_s8 = sadd.f32 %s2566_s1, %s927_s0  ;;  %s2576_s14 = spop %2575 }
0x112a   :  { %s2578_s16 = spop %2577  ;;  %s2685_s1 = smov [#allocation5]  }
0x112b   :  { %s1099_s10 = sadd.f32 %s2568_s30, %s1013_s8  ;;  %s2580_s18 = spop %2579 }
0x112c   :  { %s2582_s4 = spop %2581  ;;  %s2250_s0 = sshll.u32 %s2685_s1, 4  ;;  %s2251_s0 = int_to_ptr.vmem [resolvable:$true] %s2250_s0 }
0x112d   :  { %s1185_s12 = sadd.f32 %s2570_s9, %s1099_s10  ;;  %s2584_s21 = spop %2583 }
0x112e   :  { %s2586_s2 = spop %2585  ;;  %s2686_s8 = smov [#allocation7]  }
0x112f   :  { %s1271_s13 = sadd.f32 %s2572_s11, %s1185_s12  ;;  %s2588_s24 = spop %2587 }
0x1130   :  { %s2590_s5 = spop %2589  ;;  %s2260_s9 = sshll.u32 %s2686_s8, 4  ;;  %s2261_s9 = int_to_ptr.vmem [resolvable:$true] %s2260_s9 }
0x1131   :  { %s1357_s15 = sadd.f32 %s2574_s3, %s1271_s13  ;;  %s2592_s27 = spop %2591 }
0x1132   :  { %s2638_s12 = scalar_lea.vmem %s2251_s0, 16  ;;  %s2642_s3 = scalar_lea.vmem %s2251_s0, 32 }
0x1133   :  { %s1443_s17 = sadd.f32 %s2576_s14, %s1357_s15  ;;  %p2639_p5 = scmp.ne.s32.totalorder %s2251_s0, %s2638_s12 }
0x1134   :  { %p2643_p6 = scmp.lt.s32.totalorder %s2251_s0, %s2251_s0  ;;  %p2644_p7 = scmp.lt.s32.totalorder %s2642_s3, %s2638_s12 }
0x1135   :  { %s1529_s19 = sadd.f32 %s2578_s16, %s1443_s17 }
0x1136   :  { %p2645_p8 = por %p2644_p7, %p2643_p6 }
0x1137   :  { %s1615_s20 = sadd.f32 %s2580_s18, %s1529_s19 }
0x1138   :  { %p2646_p9 = pnand %p2645_p8, %p2639_p5 }
0x1139   :  { %s1701_s22 = sadd.f32 %s2582_s4, %s1615_s20 }
0x113b   :  { %s1787_s23 = sadd.f32 %s2584_s21, %s1701_s22 }
0x113d   :  { %s1873_s25 = sadd.f32 %s2586_s2, %s1787_s23 }
0x113f   :  { %s1959_s26 = sadd.f32 %s2588_s24, %s1873_s25 }
0x1141   :  { %s2045_s28 = sadd.f32 %s2590_s5, %s1959_s26 }
0x1143   :  { %s2131_s29 = sadd.f32 %s2592_s27, %s2045_s28 }
0x11a5   :  { %v2209_v6 = vpop.xlane.xlu1 %2208 }
0x11a6   :  { %v2210_v7 = vrot.slane %v2209_v6, 4 }
0x11a8   :  { %v2211_v8 = vadd.f32 %v2210_v7, %v2209_v6 }
0x11aa   :  { %v2212_v10 = vrot.slane %v2211_v8, 2 }
0x11ac   :  { %v2213_v11 = vadd.f32 %v2212_v10, %v2211_v8 }
0x11ae   :  { %v2214_v16 = vrot.slane %v2213_v11, 1 }
0x11b0   :  { %v2215_v17 = vadd.f32 %v2214_v16, %v2213_v11 }
0x11b2   :  { %2593 = vpush %v2215_v17 }
0x11b3   :  { %2595 = vpush %v2230_v18 }
0x11e3   :  { %s2594_s30 = spop %2593 }
0x11e4   :  { %s2217_s10 = sadd.f32 %s2594_s30, %s2131_s29  ;;  %s2596_s11 = spop %2595 }
0x11e5   :  { %v2232_v19 = vstv %s2596_s11 }
0x11e6   :  { %v2218_v20 = vstv %s2217_s10  ;;  %2233 = vst.msk [vmem:[#allocation7] sm:$0x1] %vm2219_vm8, %v2232_v19 }
0x11e7   :  { %2220 = vst.msk [vmem:[#allocation5] sm:$0x1] %vm2219_vm8, %v2218_v20 }
0x11e8   :  { %2649 = shalt.err (!%p2646_p9)
}
0x11e9   :  { %2253 = dma.vmem_to_hbm [thread:$0]  %s2251_s0, 16, %s3023_s6, [#allocation6]  }
0x11ea   :  { %s2658_s15 = scalar_lea.vmem %s2261_s9, 16  ;;  %s2662_s16 = scalar_lea.vmem %s2261_s9, 32 }
0x11eb   :  { %p2659_p10 = scmp.ne.s32.totalorder %s2261_s9, %s2658_s15  ;;  %p2663_p11 = scmp.lt.s32.totalorder %s2261_s9, %s2261_s9 }
0x11ec   :  { %p2664_p12 = scmp.lt.s32.totalorder %s2662_s16, %s2658_s15 }
0x11ee   :  { %p2665_p13 = por %p2664_p12, %p2663_p11 }
0x11f0   :  { %p2666_p0 = pnand %p2665_p13, %p2659_p10 }
0x11f2   :  { %2669 = shalt.err (!%p2666_p0)
}
0x11f3   :  { %2263 = dma.vmem_to_hbm [thread:$0]  %s2261_s9, 16, %s3024_s7, [#allocation6]  }
0x11f4   :  { %2678 = dma.done.wait [#allocation4], 64  }
0x11f5   :  { %2679 = vsyncadd [#allocation4], 4294967232 }
0x11f6   :  { %2680 = dma.done.wait [#allocation6], 32  }
0x11f7   :  { %2681 = vsyncadd [#allocation6], 4294967264 }
0x11f8   :  { %2273 = vsyncpa [#allocation4], 1 }
0x11f9   :  { %2274 = vsyncpa [#allocation6], 1 }

</bundles_post_ra>
